<compile_context>
chip_gen: v7x
topology: tpu7x:2x2x1
jax: 0.10.0
libtpu: 0.0.40
codegen_flags: <defaults>
</compile_context>

<pallas_src>
import functools

import jax
import jax.numpy as jnp
from jax.experimental import pallas as pl
from jax.experimental.pallas import tpu as pltpu


def _round_up(x, m):
    return ((x + m - 1) // m) * m


# ---------------------------------------------------------------------------
# Pallas kernel: fused {patch-embed matmul -> pooled sum -> mean -> MLP head}
# ---------------------------------------------------------------------------
def _clip_classifier_kernel(
    patches_ref,   # (TB, TP, Dpp) bf16  patch tile for this grid step
    w_emb_ref,     # (Dpp, 512)    bf16  synthetic encoder projection
    b_emb_ref,     # (1, 512)      f32
    w1_ref,        # (512, 256)    bf16  classifier layer 1
    b1_ref,        # (1, 256)      f32
    w2_ref,        # (256, NCp)    bf16  classifier layer 2 (lane-padded)
    b2_ref,        # (1, NCp)      f32
    out_ref,       # (TB, NCp)     f32
    acc_ref,       # (TB, 512)     f32   running per-batch embedding sum
    *,
    inv_num_patches: float,
):
    pi = pl.program_id(1)

    @pl.when(pi == 0)
    def _init():
        acc_ref[...] = jnp.zeros_like(acc_ref)

    tb, tp, dpp = patches_ref.shape
    feat = acc_ref.shape[-1]

    # (TB*TP, Dpp) @ (Dpp, 512) on the MXU with f32 accumulation.  TB*TP is
    # sized >= 256 rows by the wrapper so the MXU M-dimension is full.
    patches2d = patches_ref[...].reshape(tb * tp, dpp)            # bf16, free
    emb = jnp.dot(patches2d, w_emb_ref[...],
                  preferred_element_type=jnp.float32)             # (TB*TP, 512)

    # Exact f32 per-batch sum of this tile's patch embeddings (no pool matmul).
    acc_ref[...] += emb.reshape(tb, tp, feat).sum(axis=1)         # (TB, 512)

    @pl.when(pi == pl.num_programs(1) - 1)
    def _finalize():
        # mean pool (precomputed 1/P) + encoder bias (added once; equals
        # mean(x@W + b) since the bias is shared across patches).
        feats = acc_ref[...] * inv_num_patches + b_emb_ref[...]   # (TB, 512)
        h = jnp.dot(feats.astype(jnp.bfloat16), w1_ref[...],
                    preferred_element_type=jnp.float32) + b1_ref[...]
        h = jnp.maximum(h, 0.0)                                   # ReLU
        logits = jnp.dot(h.astype(jnp.bfloat16), w2_ref[...],
                         preferred_element_type=jnp.float32) + b2_ref[...]
        out_ref[...] = logits.astype(out_ref.dtype)


# ---------------------------------------------------------------------------
# Python wrapper (patchify + padding + pallas_call)
# ---------------------------------------------------------------------------
def clip_classifier_forward(x, params, *, patch: int, batch_tile=None, tile_p=None):
    """x: (B, C, H, W) float32, NCHW like the PyTorch module."""
    B, C, H, W = x.shape
    assert H % patch == 0 and W % patch == 0
    nh, nw = H // patch, W // patch
    P = nh * nw
    Dp = C * patch * patch

    w_emb, b_emb, w1, b1, w2, b2 = params
    feat_dim = w_emb.shape[1]          # 512
    hidden = w1.shape[1]               # 256
    num_classes = w2.shape[1]

    # --- lane padding (dense (8,128) vregs, unmasked stores) ----------------
    Dpp = _round_up(Dp, 128)
    NCp = _round_up(num_classes, 128)

    # --- batch tiling: a real "parallel" grid axis (2 blocks on big batches) -
    if batch_tile is None:
        batch_tile = _round_up(-(-B // 2), 8) if B >= 16 else B
    TB = min(batch_tile, B)
    Bp = _round_up(B, TB)

    # --- generation-specific VMEM budgets ------------------------------------
    try:
        vmem_cap = int(pltpu.get_tpu_info().vmem_capacity_bytes)
    except Exception:                       # fall back to v7x-safe numbers
        vmem_cap = 64 * 1024 * 1024
    if vmem_cap >= 100 * 1024 * 1024:       # 128-MiB parts (v5e / v6e)
        stream_budget = 32 * 1024 * 1024
        vmem_limit = 100 * 1024 * 1024
    else:                                   # 64-MiB parts (v7x)
        stream_budget = 16 * 1024 * 1024
        vmem_limit = 48 * 1024 * 1024

    # --- patch-axis tile: MXU M-dim first, then clamp to the VMEM budget -----
    target_m = 256                          # fills v6e/v7x 256-row MXU (>=128 on v5e)
    if tile_p is None:
        tile_p = -(-target_m // TB)
    TP = _round_up(max(int(tile_p), 1), 16)           # bf16 sublane packing = 16
    TP = min(TP, _round_up(P, 16))
    max_tp = stream_budget // (2 * TB * Dpp * 2)      # double-buffered bf16 tile
    max_tp = max(16, (max_tp // 16) * 16)
    TP = min(TP, max_tp)
    Pp = _round_up(P, TP)                   # zero-padded patches contribute 0

    # --- patchify: cast to bf16 FIRST so staging traffic is 2-byte -----------
    xb = x.astype(jnp.bfloat16)
    patches = xb.reshape(B, C, nh, patch, nw, patch)
    patches = patches.transpose(0, 2, 4, 1, 3, 5)      # (B, nh, nw, C, p, p)
    patches = patches.reshape(B, P, Dp)
    patches = jnp.pad(patches, ((0, Bp - B), (0, Pp - P), (0, Dpp - Dp)))

    w_emb_p = jnp.pad(w_emb, ((0, Dpp - Dp), (0, 0))).astype(jnp.bfloat16)
    b_emb_p = b_emb.reshape(1, feat_dim).astype(jnp.float32)
    w1_p = w1.astype(jnp.bfloat16)
    b1_p = b1.reshape(1, hidden).astype(jnp.float32)
    w2_p = jnp.pad(w2, ((0, 0), (0, NCp - num_classes))).astype(jnp.bfloat16)
    b2_p = jnp.pad(b2.reshape(1, num_classes),
                   ((0, 0), (0, NCp - num_classes))).astype(jnp.float32)

    grid = (Bp // TB, Pp // TP)   # (batch blocks [parallel], patch reduction)

    in_specs = [
        pl.BlockSpec((TB, TP, Dpp), lambda bi, pi: (bi, pi, 0)),   # streamed
        pl.BlockSpec((Dpp, feat_dim), lambda bi, pi: (0, 0)),      # weights stay
        pl.BlockSpec((1, feat_dim), lambda bi, pi: (0, 0)),        # VMEM-resident
        pl.BlockSpec((feat_dim, hidden), lambda bi, pi: (0, 0)),
        pl.BlockSpec((1, hidden), lambda bi, pi: (0, 0)),
        pl.BlockSpec((hidden, NCp), lambda bi, pi: (0, 0)),
        pl.BlockSpec((1, NCp), lambda bi, pi: (0, 0)),
    ]
    out_specs = pl.BlockSpec((TB, NCp), lambda bi, pi: (bi, 0))

    flops = (2 * Bp * Pp * Dpp * feat_dim          # patch embed (MXU)
             + Bp * Pp * feat_dim                  # pooling sum (VPU)
             + 2 * Bp * feat_dim * hidden          # head layer 1
             + 2 * Bp * hidden * NCp)              # head layer 2
    bytes_accessed = (patches.size * 2
                      + w_emb_p.size * 2 + w1_p.size * 2 + w2_p.size * 2
                      + (b_emb_p.size + b1_p.size + b2_p.size) * 4
                      + Bp * NCp * 4)
    cost = pl.CostEstimate(flops=flops, transcendentals=0,
                           bytes_accessed=bytes_accessed)

    kernel = functools.partial(_clip_classifier_kernel,
                               inv_num_patches=1.0 / P)

    out = pl.pallas_call(
        kernel,
        out_shape=jax.ShapeDtypeStruct((Bp, NCp), jnp.float32),
        grid_spec=pltpu.PrefetchScalarGridSpec(
            num_scalar_prefetch=0,
            grid=grid,
            in_specs=in_specs,
            out_specs=out_specs,
            scratch_shapes=[pltpu.VMEM((TB, feat_dim), jnp.float32)],
        ),
        compiler_params=pltpu.CompilerParams(
            dimension_semantics=("parallel", "arbitrary"),
            vmem_limit_bytes=vmem_limit,
        ),
        cost_estimate=cost,
    )(patches, w_emb_p, b_emb_p, w1_p, b1_p, w2_p, b2_p)

    return out[:B, :num_classes]          # strip batch/lane padding


# ---------------------------------------------------------------------------
# Deterministic parameter construction
# ---------------------------------------------------------------------------
def make_params(key, patch_dim, feat_dim=512, hidden=256, num_classes=10):
    k = jax.random.split(key, 6)
    w_emb = jax.random.normal(k[0], (patch_dim, feat_dim), jnp.float32) * 0.02
    b_emb = jax.random.normal(k[1], (feat_dim,), jnp.float32) * 0.01
    w1 = jax.random.normal(k[2], (feat_dim, hidden), jnp.float32) * 0.02
    b1 = jax.random.normal(k[3], (hidden,), jnp.float32) * 0.01
    w2 = jax.random.normal(k[4], (hidden, num_classes), jnp.float32) * 0.02
    b2 = jax.random.normal(k[5], (num_classes,), jnp.float32) * 0.01
    return (w_emb, b_emb, w1, b1, w2, b2)


# ---------------------------------------------------------------------------
# Pure-JAX reference (same math, same bf16 inputs / f32 accumulation)
# ---------------------------------------------------------------------------
def reference_forward(x, params, *, patch: int):
    B, C, H, W = x.shape
    nh, nw = H // patch, W // patch
    P = nh * nw
    patches = x.astype(jnp.bfloat16).reshape(B, C, nh, patch, nw, patch)
    patches = patches.transpose(0, 2, 4, 1, 3, 5).reshape(B * P, -1)
    w_emb, b_emb, w1, b1, w2, b2 = params
    emb = jnp.dot(patches, w_emb.astype(jnp.bfloat16),
                  preferred_element_type=jnp.float32)
    feats = emb.reshape(B, P, -1).mean(axis=1) + b_emb.reshape(1, -1)
    h = jnp.dot(feats.astype(jnp.bfloat16), w1.astype(jnp.bfloat16),
                preferred_element_type=jnp.float32) + b1.reshape(1, -1)
    h = jnp.maximum(h, 0.0)
    return jnp.dot(h.astype(jnp.bfloat16), w2.astype(jnp.bfloat16),
                   preferred_element_type=jnp.float32) + b2.reshape(1, -1)


if __name__ == "__main__":
    key = jax.random.PRNGKey(0)
    kx, kp = jax.random.split(key)

    # Small image-like input: batch=16, channels=3, spatial=32x32, patch=4
    # -> 64 patches of feature dim 48 (lane-padded to 128 inside the wrapper).
    # Default heuristics give TB=8 (2 batch-parallel blocks) and TP=32
    # (2 reduction steps, MXU M = TB*TP = 256), exercising the full
    # init / accumulate / finalize path on both grid axes.
    B, C, H, W = 16, 3, 32, 32
    patch = 4
    x = jax.random.normal(kx, (B, C, H, W), jnp.float32)

    params = make_params(kp, patch_dim=C * patch * patch, num_classes=10)

    out = clip_classifier_forward(x, params, patch=patch)
    out = jax.block_until_ready(out)

    ref = reference_forward(x, params, patch=patch)
    assert out.shape == (B, 10)
    assert jnp.allclose(out, ref, atol=2e-3, rtol=2e-3), "mismatch vs reference"

    print("KERNEL_OK")
</pallas_src>

<mosaic_0001>
module attributes {stable_mosaic.version = 11 : i64} {
  func.func @_clip_classifier_kernel(%arg0: i32, %arg1: i32, %arg2: memref<8x32x128xbf16, #tpu.memory_space<vmem>>, %arg3: memref<128x512xbf16, #tpu.memory_space<vmem>>, %arg4: memref<1x512xf32, #tpu.memory_space<vmem>>, %arg5: memref<512x256xbf16, #tpu.memory_space<vmem>>, %arg6: memref<1x256xf32, #tpu.memory_space<vmem>>, %arg7: memref<256x128xbf16, #tpu.memory_space<vmem>>, %arg8: memref<1x128xf32, #tpu.memory_space<vmem>>, %arg9: memref<8x128xf32, #tpu.memory_space<vmem>>, %arg10: memref<8x512xf32, #tpu.memory_space<vmem>>) attributes {dimension_semantics = [#tpu.dimension_semantics<parallel>, #tpu.dimension_semantics<arbitrary>], iteration_bounds = array<i64: 2, 2>, scalar_prefetch = 0 : i64, scratch_operands = 1 : i64, tpu.core_type = #tpu.core_type<tc>, window_params = [{transform_indices = @transform_0, window_bounds = array<i64: 8, 32, 128>}, {pipeline_mode = #tpu.pipeline_mode<synchronous>, transform_indices = @transform_1, window_bounds = array<i64: 128, 512>}, {pipeline_mode = #tpu.pipeline_mode<synchronous>, transform_indices = @transform_2, window_bounds = array<i64: 1, 512>}, {pipeline_mode = #tpu.pipeline_mode<synchronous>, transform_indices = @transform_3, window_bounds = array<i64: 512, 256>}, {pipeline_mode = #tpu.pipeline_mode<synchronous>, transform_indices = @transform_4, window_bounds = array<i64: 1, 256>}, {pipeline_mode = #tpu.pipeline_mode<synchronous>, transform_indices = @transform_5, window_bounds = array<i64: 256, 128>}, {pipeline_mode = #tpu.pipeline_mode<synchronous>, transform_indices = @transform_6, window_bounds = array<i64: 1, 128>}, {transform_indices = @transform_7, window_bounds = array<i64: 8, 128>}]} {
    %c0_i32 = arith.constant 0 : i32
    %0 = arith.cmpi eq, %arg1, %c0_i32 : i32
    %1 = arith.extui %0 : i1 to i32
    %c0_i32_0 = arith.constant 0 : i32
    %2 = arith.cmpi ne, %1, %c0_i32_0 : i32
    scf.if %2 {
      %cst_11 = arith.constant 0.000000e+00 : f32
      %15 = vector.broadcast %cst_11 : f32 to vector<8x512xf32>
      %c0_12 = arith.constant 0 : index
      %c0_13 = arith.constant 0 : index
      %16 = vector.load %arg10[%c0_12, %c0_13] : memref<8x512xf32, #tpu.memory_space<vmem>>, vector<8x512xf32>
      tpu.vector_store %arg10[%c0_12, %c0_13], %15 {strides = array<i32>} : memref<8x512xf32, #tpu.memory_space<vmem>>, vector<8x512xf32>,
    } else {
    }
    %c0 = arith.constant 0 : index
    %c0_1 = arith.constant 0 : index
    %c0_2 = arith.constant 0 : index
    %3 = vector.load %arg2[%c0, %c0_1, %c0_2] : memref<8x32x128xbf16, #tpu.memory_space<vmem>>, vector<8x32x128xbf16>
    %4 = vector.shape_cast %3 : vector<8x32x128xbf16> to vector<256x128xbf16>
    %c0_3 = arith.constant 0 : index
    %c0_4 = arith.constant 0 : index
    %5 = vector.load %arg3[%c0_3, %c0_4] : memref<128x512xbf16, #tpu.memory_space<vmem>>, vector<128x512xbf16>
    %cst = arith.constant dense<0.000000e+00> : vector<256x512xf32>
    %6 = tpu.matmul %4, %5, %cst {dimension_numbers = #tpu.dot_dimension_numbers<[1], [0], [0], [1], [0, 0, 1, 1], [], []>} : vector<256x128xbf16>, vector<128x512xbf16>, vector<256x512xf32> -> vector<256x512xf32>
    %c0_5 = arith.constant 0 : index
    %c0_6 = arith.constant 0 : index
    %7 = vector.load %arg10[%c0_5, %c0_6] : memref<8x512xf32, #tpu.memory_space<vmem>>, vector<8x512xf32>
    %8 = vector.shape_cast %6 : vector<256x512xf32> to vector<8x32x512xf32>
    %cst_7 = arith.constant dense<0.000000e+00> : vector<8x512xf32>
    %9 = vector.multi_reduction <add>, %8, %cst_7 [1] : vector<8x32x512xf32> to vector<8x512xf32>
    %10 = arith.addf %7, %9 : vector<8x512xf32>
    %c0_8 = arith.constant 0 : index
    %c0_9 = arith.constant 0 : index
    %11 = vector.load %arg10[%c0_8, %c0_9] : memref<8x512xf32, #tpu.memory_space<vmem>>, vector<8x512xf32>
    tpu.vector_store %arg10[%c0_8, %c0_9], %10 {strides = array<i32>} : memref<8x512xf32, #tpu.memory_space<vmem>>, vector<8x512xf32>,
    %c1_i32 = arith.constant 1 : i32
    %12 = arith.cmpi eq, %arg1, %c1_i32 : i32
    %13 = arith.extui %12 : i1 to i32
    %c0_i32_10 = arith.constant 0 : i32
    %14 = arith.cmpi ne, %13, %c0_i32_10 : i32
    scf.if %14 {
      %c0_11 = arith.constant 0 : index
      %c0_12 = arith.constant 0 : index
      %15 = vector.load %arg10[%c0_11, %c0_12] : memref<8x512xf32, #tpu.memory_space<vmem>>, vector<8x512xf32>
      %cst_13 = arith.constant 1.562500e-02 : f32
      %16 = vector.broadcast %cst_13 : f32 to vector<8x512xf32>
      %17 = arith.mulf %15, %16 : vector<8x512xf32>
      %c0_14 = arith.constant 0 : index
      %c0_15 = arith.constant 0 : index
      %18 = vector.load %arg4[%c0_14, %c0_15] : memref<1x512xf32, #tpu.memory_space<vmem>>, vector<1x512xf32>
      %19 = vector.broadcast %18 : vector<1x512xf32> to vector<8x512xf32>
      %20 = arith.addf %17, %19 : vector<8x512xf32>
      %21 = arith.truncf %20 : vector<8x512xf32> to vector<8x512xbf16>
      %c0_16 = arith.constant 0 : index
      %c0_17 = arith.constant 0 : index
      %22 = vector.load %arg5[%c0_16, %c0_17] : memref<512x256xbf16, #tpu.memory_space<vmem>>, vector<512x256xbf16>
      %cst_18 = arith.constant dense<0.000000e+00> : vector<8x256xf32>
      %23 = tpu.matmul %21, %22, %cst_18 {dimension_numbers = #tpu.dot_dimension_numbers<[1], [0], [0], [1], [0, 0, 1, 1], [], []>} : vector<8x512xbf16>, vector<512x256xbf16>, vector<8x256xf32> -> vector<8x256xf32>
      %c0_19 = arith.constant 0 : index
      %c0_20 = arith.constant 0 : index
      %24 = vector.load %arg6[%c0_19, %c0_20] : memref<1x256xf32, #tpu.memory_space<vmem>>, vector<1x256xf32>
      %25 = vector.broadcast %24 : vector<1x256xf32> to vector<8x256xf32>
      %26 = arith.addf %23, %25 : vector<8x256xf32>
      %cst_21 = arith.constant 0.000000e+00 : f32
      %27 = vector.broadcast %cst_21 : f32 to vector<8x256xf32>
      %28 = arith.maximumf %26, %27 : vector<8x256xf32>
      %29 = arith.truncf %28 : vector<8x256xf32> to vector<8x256xbf16>
      %c0_22 = arith.constant 0 : index
      %c0_23 = arith.constant 0 : index
      %30 = vector.load %arg7[%c0_22, %c0_23] : memref<256x128xbf16, #tpu.memory_space<vmem>>, vector<256x128xbf16>
      %cst_24 = arith.constant dense<0.000000e+00> : vector<8x128xf32>
      %31 = tpu.matmul %29, %30, %cst_24 {dimension_numbers = #tpu.dot_dimension_numbers<[1], [0], [0], [1], [0, 0, 1, 1], [], []>} : vector<8x256xbf16>, vector<256x128xbf16>, vector<8x128xf32> -> vector<8x128xf32>
      %c0_25 = arith.constant 0 : index
      %c0_26 = arith.constant 0 : index
      %32 = vector.load %arg8[%c0_25, %c0_26] : memref<1x128xf32, #tpu.memory_space<vmem>>, vector<1x128xf32>
      %33 = vector.broadcast %32 : vector<1x128xf32> to vector<8x128xf32>
      %34 = arith.addf %31, %33 : vector<8x128xf32>
      %c0_27 = arith.constant 0 : index
      %c0_28 = arith.constant 0 : index
      %35 = vector.load %arg9[%c0_27, %c0_28] : memref<8x128xf32, #tpu.memory_space<vmem>>, vector<8x128xf32>
      tpu.vector_store %arg9[%c0_27, %c0_28], %34 {strides = array<i32>} : memref<8x128xf32, #tpu.memory_space<vmem>>, vector<8x128xf32>,
    } else {
    }
    return
  }
  func.func @transform_0(%arg0: i32, %arg1: i32) -> (i32, i32, i32) {
    %c0_i32 = arith.constant 0 : i32
    %c0_i32_0 = arith.constant 0 : i32
    return %arg0, %arg1, %c0_i32 : i32, i32, i32
  }
  func.func @transform_1(%arg0: i32, %arg1: i32) -> (i32, i32) {
    %c0_i32 = arith.constant 0 : i32
    %c0_i32_0 = arith.constant 0 : i32
    %c0_i32_1 = arith.constant 0 : i32
    return %c0_i32, %c0_i32_0 : i32, i32
  }
  func.func @transform_2(%arg0: i32, %arg1: i32) -> (i32, i32) {
    %c0_i32 = arith.constant 0 : i32
    %c0_i32_0 = arith.constant 0 : i32
    %c0_i32_1 = arith.constant 0 : i32
    return %c0_i32, %c0_i32_0 : i32, i32
  }
  func.func @transform_3(%arg0: i32, %arg1: i32) -> (i32, i32) {
    %c0_i32 = arith.constant 0 : i32
    %c0_i32_0 = arith.constant 0 : i32
    %c0_i32_1 = arith.constant 0 : i32
    return %c0_i32, %c0_i32_0 : i32, i32
  }
  func.func @transform_4(%arg0: i32, %arg1: i32) -> (i32, i32) {
    %c0_i32 = arith.constant 0 : i32
    %c0_i32_0 = arith.constant 0 : i32
    %c0_i32_1 = arith.constant 0 : i32
    return %c0_i32, %c0_i32_0 : i32, i32
  }
  func.func @transform_5(%arg0: i32, %arg1: i32) -> (i32, i32) {
    %c0_i32 = arith.constant 0 : i32
    %c0_i32_0 = arith.constant 0 : i32
    %c0_i32_1 = arith.constant 0 : i32
    return %c0_i32, %c0_i32_0 : i32, i32
  }
  func.func @transform_6(%arg0: i32, %arg1: i32) -> (i32, i32) {
    %c0_i32 = arith.constant 0 : i32
    %c0_i32_0 = arith.constant 0 : i32
    %c0_i32_1 = arith.constant 0 : i32
    return %c0_i32, %c0_i32_0 : i32, i32
  }
  func.func @transform_7(%arg0: i32, %arg1: i32) -> (i32, i32) {
    %c0_i32 = arith.constant 0 : i32
    %c0_i32_0 = arith.constant 0 : i32
    return %arg0, %c0_i32 : i32, i32
  }
}

</mosaic_0001>

<bundles_post_ra>
// kernel: tpu_custom_call.1
= control target key start
LH: loop header
LB: loop body
LE: loop exit
PB: predicated region body
PF: predicated region fallthrough
CT: control target
= control target key end

     0   :  { %s3475_s0 = inlined_call_operand.hbm [shape: bf16[16,64,128], index: 0, kind: input, shape index: {}]   ;;  %s3476_s1 = inlined_call_operand.hbm [shape: bf16[128,512], index: 1, kind: input, shape index: {}]   ;;  %s3477_s2 = inlined_call_operand.vmem [shape: f32[1,512], index: 2, kind: input, shape index: {}]   ;;  %s3478_s3 = inlined_call_operand.hbm [shape: bf16[512,256], index: 3, kind: input, shape index: {}]   ;;  %s3479_s4 = inlined_call_operand.vmem [shape: f32[1,256], index: 4, kind: input, shape index: {}]   ;;  %s3480_s5 = inlined_call_operand.hbm [shape: bf16[256,128], index: 5, kind: input, shape index: {}]   ;;  %s3481_s6 = inlined_call_operand.vmem [shape: f32[1,128], index: 6, kind: input, shape index: {}]   ;;  %s3482_s7 = inlined_call_operand.hbm [shape: f32[16,128], index: 7, kind: output, shape index: {}]  }
   0x1   :  { %3497 = sst [smem:[#allocation28_spill]] %s3476_s1 }
   0x2   :  { %3498 = sst [smem:[#allocation29_spill]] %s3479_s4 }
   0x3   :  { %3499 = sst [smem:[#allocation30_spill]] %s3481_s6 }
   0x4   :  { %3500 = sst [smem:[#allocation31_spill]] %s3482_s7 }
   0x5   :  { %12 = vsyncpa [#allocation4], 0 }
   0x6   :  { %14 = vsyncpa [#allocation4 + $0x1], 0 }
   0x7   :  { %15 = vsyncpa [#allocation7], 0 }
   0x8   :  { %16 = vsyncpa [#allocation10], 0 }
   0x9   :  { %17 = vsyncpa [#allocation5], 0 }
   0xa   :  { %19 = vsyncpa [#allocation5 + $0x1], 0  ;;  %s3077_s24 = smov 0   ;;  %s3079_s25 = smov 0  }
   0xb   :  { %s3081_s26 = smov 0   ;;  %s3083_s27 = smov 0  }
   0xc   :  { %s3085_s28 = smov 0   ;;  %s3087_s29 = smov 0  }
   0xd   :  { %s3089_s30 = smov 0   ;;  %s3091_s8 = smov 0  }
   0xe   :  { %s3093_s9 = smov 0   ;;  %s3095_s10 = smov 0  }
   0xf   :  { %s3097_s11 = smov 0  }
  0x10 LB: > { %3501 = sst [smem:[#allocation19_spill]] %s2978_s24  ;;  %s2298_s12 = sadd.s32 4294967295, %s3018_s11   ;;  %s3018_s11 = sphi %s3097_s11, %s25_s11   ;;  %s3014_s10 = sphi %s3095_s10, %s3545_s10   ;;  %s3010_s9 = sphi %s3093_s9, %s3544_s9   ;;  %s3006_s8 = sphi %s3091_s8, %s3543_s8   ;;  %s3002_s30 = sphi %s3089_s30, %s3542_s30   ;;  %s2998_s29 = sphi %s3087_s29, %s3541_s29   ;;  %s2994_s28 = sphi %s3085_s28, %s3540_s28   ;;  %s2990_s27 = sphi %s3083_s27, %s3539_s27   ;;  %s2986_s26 = sphi %s3081_s26, %s3533_s26   ;;  %s2982_s25 = sphi %s3079_s25, %s3538_s25   ;;  %s2978_s24 = sphi %s3077_s24, %s3537_s24  }
  0x11   : > { %3502 = sst [smem:[#allocation20_spill]] %s2986_s26  ;;  %s2299_s13 = sadd.s32 4294967294, %s3018_s11  }
  0x12   : > { %3503 = sst [smem:[#allocation21_spill]] %s3006_s8  ;;  %s34_s14 = sadd.s32 1, %s3010_s9 }
  0x13   : > { %s37_s15 = sadd.s32 1, %s3014_s10  ;;  %p35_p0 = scmp.ge.s32.totalorder %s34_s14, 2 }
  0x14   : > { %s46_s16 = sadd.s32 1, %s2998_s29  ;;  %p53_p1 = scmp.ne.s32.totalorder %s2998_s29, %s2994_s28 }
  0x15   : > { %p54_p2 = scmp.eq.s32.totalorder %s3018_s11, 0  ;;  %s3547_s14 = smov (%p35_p0, %s34_s14), 0 }
  0x16   : > { %3504 = sst [smem:[#allocation22_spill]] %s3547_s14  ;;  %s3549_s15 = smov (!%p35_p0, %s37_s15), %s3014_s10 }
  0x17   : > { %s42_s17 = ssub.s32 %s3010_s9, %s3547_s14  ;;  %p3143_p3 = por %p54_p2, %p53_p1 }
  0x18   : > { %p39_p4 = scmp.ge.s32.totalorder %s3549_s15, 2  ;;  %p59_p5 = scmp.ne.s32.totalorder %s2994_s28, %s2990_s27 }
  0x19   : > { %s3505_s18 = scalar_select %p3143_p3, 1, 0 }
  0x1a   : > { %p3148_p6 = scmp.eq.s32.totalorder %s2298_s12, 0  ;;  %s198_s20 = sadd.s32 1, %s2986_s26 }
  0x1b   : > { %s3551_s15 = smov (%p39_p4, %s3549_s15), 0  ;;  %p208_p8 = scmp.ne.s32.totalorder %s2986_s26, %s2982_s25 }
  0x1c   : > { %s3506_s19 = scalar_select %p3148_p6, 1, 0 }
  0x1d   : > { %3507 = sst [smem:[#allocation23_spill]] %s3551_s15  ;;  %p3157_p7 = por %p3148_p6, %p59_p5 }
  0x1e   : > { %s41_s22 = ssub.s32 %s3014_s10, %s3551_s15  ;;  %p209_p9 = scmp.eq.s32.totalorder %s2298_s12, 3 }
  0x1f   : > { %s3508_s21 = scalar_select %p3157_p7, 1, 0 }
  0x20   : > { %s43_s23 = sor.u32 %s42_s17, %s41_s22  ;;  %p196_p10 = scmp.eq.s32.totalorder %s41_s22, 0 }
  0x21   : > { %p44_p11 = scmp.eq.s32.totalorder %s43_s23, 0  ;;  %p3165_p12 = por %p209_p9, %p208_p8 }
  0x22   : > { %s3170_s14 = scalar_select %p196_p10, %s2986_s26, %s198_s20  }
  0x23   : > { %s3509_s27 = scalar_select %p3165_p12, 1, 0 }
  0x24   : > { %3511 = sst [smem:[#allocation25_spill]] %s3170_s14  ;;  %p214_p13 = scmp.ne.s32.totalorder %s2982_s25, %s2978_s24 }
  0x25   : > { %3510 = sst [smem:[#allocation24_spill]] %s3509_s27  ;;  %p215_p0 = scmp.eq.s32.totalorder %s2299_s13, 3 }
  0x26   : > { %s3173_s7 = scalar_select %p44_p11, %s2998_s29, %s46_s16  }
  0x27   : > { %p2300_p1 = scmp.ge.s32.totalorder %s3018_s11, 1  ;;  %p222_p2 = scmp.lt.s32.totalorder %s3018_s11, 5 }
  0x28   : > { %3512 = sst [smem:[#allocation26_spill]] %s3173_s7  ;;  %p3179_p4 = por %p215_p0, %p214_p13 }
  0x29   : > { %p3183_p5 = pnand %p2300_p1, %p222_p2  ;;  %s3020_s17 = smov [#allocation6]  }
  0x2a   : > { %s3513_s8 = scalar_select %p3179_p4, 1, 0 }
  0x2b   : > { %s3515_s12 = scalar_select %p3183_p5, 1, 0 }
  0x2c   : > { %3514 = sst [smem:[#allocation27_spill]] %s3513_s8  ;;  %s234_s22 = sshll.u32 %s3020_s17, 4  ;;  %s235_s22 = int_to_ptr.vmem [resolvable:$true] %s234_s22 }
  0x2d   : > { %p2503_p8 = pneg %p3183_p5  ;;  %s3021_s13 = smov [#allocation8]  }
  0x2e   : > { %s250_s20 = sshll.u32 %s3021_s13, 4  ;;  %s3517_s1 = sld [smem:[#allocation28_spill]]  ;;  %s3195_s20 = int_to_ptr.vmem [resolvable:$true] %s250_s20 }
  0x2f   : > { %p3191_p9 = pnand %p2503_p8, %p3148_p6 }
  0x31   : > { %p3205_p11 = pneg %p3191_p9 }
  0x34   : > { %s2804_s7 = scalar_lea.hbm %s3517_s1, 4096 }
  0x35   : > { %p2805_p10 = scmp.ne.s32.totalorder %s3517_s1, %s2804_s7  ;;  %p2811_p1 = scmp.lt.u32.totalorder %s2804_s7, %s3517_s1 }
  0x37   : > { %p2807_p13 = pnand %p3205_p11, %p2805_p10 }
  0x39   : > { %p2808_p0 = pneg %p2807_p13 }
  0x3b   : > { %p2813_p2 = pnand %p2811_p1, %p2808_p0 }
  0x3d   : > { %2816 = shalt.err (!%p2813_p2)
}
  0x3e   : > { %s2817_s15 = scalar_lea.vmem %s235_s22, 4096  ;;  %p2825_p6 = scmp.lt.s32.totalorder %s235_s22, %s235_s22 }
  0x3f   : > { %p2818_p8 = scmp.ne.s32.totalorder %s235_s22, %s2817_s15  ;;  %p2826_p7 = scmp.lt.s32.totalorder %s2817_s15, %s2817_s15 }
  0x41   : > { %p2820_p4 = pnand %p2818_p8, %p3205_p11  ;;  %p2827_p5 = por %p2826_p7, %p2825_p6 }
  0x43   : > { %p2821_p12 = pneg %p2820_p4 }
  0x45   : > { %p2828_p3 = pnand %p2827_p5, %p2821_p12 }
  0x47   : > { %2831 = shalt.err (!%p2828_p3)
}
  0x48   : > { %s3022_s26 = smov 256   ;;  %s3023_s14 = smov 16  }
  0x49   : > { %2506 = dma.hbm_to_vmem [thread:$0]  (!%p3191_p9), %s3517_s1, 4096, %s235_s22, [#allocation7], %s3022_s26, %s3022_s26, %s3023_s14  }
  0x4a   : > { %s2832_s24 = scalar_lea.hbm %s3478_s3, 8192 }
  0x4b   : > { %p2833_p4 = scmp.ne.s32.totalorder %s3478_s3, %s2832_s24  ;;  %p2839_p7 = scmp.lt.u32.totalorder %s2832_s24, %s3478_s3 }
  0x4d   : > { %p2835_p6 = pnand %p2833_p4, %p3205_p11 }
  0x4f   : > { %p2836_p3 = pneg %p2835_p6 }
  0x51   : > { %p2841_p12 = pnand %p2839_p7, %p2836_p3 }
  0x53   : > { %2844 = shalt.err (!%p2841_p12)
}
  0x54   : > { %s2845_s22 = scalar_lea.vmem %s3195_s20, 8192  ;;  %p2853_p0 = scmp.lt.s32.totalorder %s3195_s20, %s3195_s20 }
  0x55   : > { %p2846_p5 = scmp.ne.s32.totalorder %s3195_s20, %s2845_s22  ;;  %p2854_p1 = scmp.lt.s32.totalorder %s2845_s22, %s2845_s22 }
  0x57   : > { %p2848_p10 = pnand %p2846_p5, %p3205_p11  ;;  %p2855_p2 = por %p2854_p1, %p2853_p0 }
  0x59   : > { %p2849_p13 = pneg %p2848_p10 }
  0x5b   : > { %p2856_p8 = pnand %p2855_p2, %p2849_p13 }
  0x5d   : > { %2859 = shalt.err (!%p2856_p8)
}
  0x5e   : > { %s3024_s6 = smov 128   ;;  %s3025_s4 = smov 8  }
  0x5f   : > { %2509 = dma.hbm_to_vmem [thread:$0]  (!%p3191_p9), %s3478_s3, 8192, %s3195_s20, [#allocation7], %s3024_s6, %s3024_s6, %s3025_s4  }
  0x60   : > { %s3026_s26 = smov [#allocation9]   ;;  %s2860_s23 = scalar_lea.hbm %s3480_s5, 2048 }
  0x61   : > { %s266_s14 = sshll.u32 %s3026_s26, 4  ;;  %p2861_p4 = scmp.ne.s32.totalorder %s3480_s5, %s2860_s23  ;;  %s267_s14 = int_to_ptr.vmem [resolvable:$true] %s266_s14 }
  0x62   : > { %p2867_p7 = scmp.lt.u32.totalorder %s2860_s23, %s3480_s5 }
  0x63   : > { %p2863_p6 = pnand %p2861_p4, %p3205_p11 }
  0x65   : > { %p2864_p3 = pneg %p2863_p6 }
  0x67   : > { %p2869_p12 = pnand %p2867_p7, %p2864_p3 }
  0x69   : > { %2872 = shalt.err (!%p2869_p12)
}
  0x6a   : > { %s2873_s20 = scalar_lea.vmem %s267_s14, 2048  ;;  %p2881_p0 = scmp.lt.s32.totalorder %s267_s14, %s267_s14 }
  0x6b   : > { %p2874_p5 = scmp.ne.s32.totalorder %s267_s14, %s2873_s20  ;;  %p2882_p1 = scmp.lt.s32.totalorder %s2873_s20, %s2873_s20 }
  0x6d   : > { %p2876_p10 = pnand %p2874_p5, %p3205_p11  ;;  %p2883_p2 = por %p2882_p1, %p2881_p0 }
  0x6f   : > { %p2877_p13 = pneg %p2876_p10 }
  0x71   : > { %p2884_p8 = pnand %p2883_p2, %p2877_p13 }
  0x73   : > { %2887 = shalt.err (!%p2884_p8)
}
  0x74   : > { %s3027_s6 = smov 64   ;;  %s3028_s4 = smov 4  }
  0x75   : > { %2512 = dma.hbm_to_vmem [thread:$0]  (!%p3191_p9), %s3480_s5, 2048, %s267_s14, [#allocation10], %s3027_s6, %s3027_s6, %s3028_s4  }
  0x76   : > { %p2304_p4 = scmp.ge.s32.totalorder %s3018_s11, 4 }
  0x78   : > { %279 = sbr.rel (%p2304_p4) target bundleno = 144 (0x90), region = 40 }
  0x7f   : > { %s283_s17 = sand.u32 1, %s2998_s29   ;;  %s2307_s27 = sshll.u32 %s3010_s9, 2 }
  0x80   : > { %s2305_s26 = sshll.u32 %s283_s17, 7  ;;  %s2453_s8 = sshll.u32 %s3014_s10, 6 }
  0x81   : > { %s294_s16 = sadd.s32 %s2453_s8, %s2307_s27  ;;  %s287_s7 = scalar_lea.vmem [#allocation3], %s2305_s26 }
  0x82   : > { %s309_s14 = sshll.u32 %s287_s7, 4  ;;  %s2309_s23 = sshll.u32 %s294_s16, 6  ;;  %s310_s14 = int_to_ptr.vmem [resolvable:$true] %s309_s14 }
  0x83   : > { %p3519_p9 = scmp.ne.s32.totalorder %s3505_s18, 0  ;;  %s3029_s15 = smov 512  }
  0x84   : > { %s3030_s20 = smov 256   ;;  %s3031_s6 = smov 4  }
  0x85   : > { %s2486_s13 = scalar_select %p3519_p9, [#allocation0], [#allocation14] }
  0x86   : > { %2487 = sst [smem:[#allocation13]] (%p3519_p9), %s3029_s15  ;;  %s3032_s4 = smov 64  }
  0x87   : > { %s301_s22 = sld [smem:[%s2486_s13]]   ;;  %s296_s27 = scalar_lea.hbm %s3475_s0, %s2309_s23 }
  0x88   : > { %2488 = sst [smem:[#allocation13 + $0x1]] (%p3519_p9), %s3030_s20  ;;  %s284_s16 = scalar_lea.sflag [#allocation4], %s283_s17 }
  0x89   : > { %2489 = sst [smem:[#allocation13 + $0x2]] (%p3519_p9), %s3031_s6  ;;  %s3033_s7 = smov [#allocation12]  }
  0x8a   : > { %2490 = sst [smem:[#allocation13 + $0x3]] (%p3519_p9), %s3032_s4 }
  0x8b   : > { %2491 = sst [smem:[#allocation13 + $0x4]] (%p3519_p9), %s3032_s4 }
  0x8c   : > { %2492 = sst [smem:[#allocation13 + $0x5]] (%p3519_p9), %s3031_s6 }
  0x8d   : > { %s2310_s26 = sshll.u32 %s301_s22, 26 }
  0x8e   : > { %s2311_s8 = sadd.s32 134217728, %s2310_s26 }
  0x8f   : > { %2493 = dma.general (%p3519_p9), %s296_s27, 2048, %s310_s14, %s284_s16, %s3033_s7, [#allocation13], %s2311_s8, 0  }
  0x90 PF: > { %p3520_p11 = scmp.ne.s32.totalorder %s3515_s12, 0 }
  0x91   : > { %s336_s13 = sand.u32 (!%p3520_p11), 1, %s2994_s28   ;;  %p3521_p6 = scmp.ne.s32.totalorder (!%p3520_p11), %s3508_s21, 0 }
  0x92   : > { %334 = sbr.rel (%p3520_p11) target bundleno = 1073 (0x431), region = 48  ;;  %s2313_s15 = sshll.u32 (!%p3520_p11), %s336_s13, 7 }
  0x93   : > { %s337_s20 = scalar_lea.sflag (!%p3520_p11), [#allocation4], %s336_s13  ;;  %s3288_s23 = scalar_lea.vmem (!%p3520_p11), [#allocation3], %s2313_s15 }
  0x99   : > { %2961 = dma.done.wait (%p3521_p6), %s337_s20, 2048  }
  0x9a   : > { %2963 = vsyncadd (%p3521_p6), %s337_s20, 4294965248  ;;  %p3522_p3 = scmp.ne.s32.totalorder %s3506_s19, 0 }
  0x9c   : > { %2965 = dma.done.wait (%p3522_p3), [#allocation7], 12288  }
  0x9d   : > { %2967 = vsyncadd (%p3522_p3), [#allocation7], 4294955008 }
  0x9e   : > { %2969 = dma.done.wait (%p3522_p3), [#allocation10], 2048  }
  0x9f   : > { %2971 = vsyncadd (%p3522_p3), [#allocation10], 4294965248  ;;  %s380_s18 = sand.u32 1, %s2982_s25   ;;  %p2318_p7 = scmp.ne.s32.totalorder %s3002_s30, 0 }
  0xa0   : > { %s3305_s12 = sshll.u32 %s380_s18, 3  ;;  %v3034_v0 = vmov (!%p2318_p7), 0.0  }
  0xa1   : > { %s382_s21 = scalar_lea.vmem [#allocation11], %s3305_s12  ;;  %389 = sbr.rel (%p2318_p7) target bundleno = 168 (0xa8), region = 68  ;;  %390 = vst [vmem:[#allocation2] sm:$0xff] (!%p2318_p7), %v3034_v0  ;;  %391 = vst [vmem:[#allocation2 + $0x8] sm:$0xff] (!%p2318_p7), %v3034_v0 }
  0xa2   : > { %392 = vst [vmem:[#allocation2 + $0x10] sm:$0xff] (!%p2318_p7), %v3034_v0  ;;  %393 = vst [vmem:[#allocation2 + $0x18] sm:$0xff] (!%p2318_p7), %v3034_v0 }
  0xa8 PF: > { %v2628_v1 = vld [vmem:[#allocation6 + $0x4] ss:$16 sps:$4 sm:$0xff]   ;;  %v2630_v2 = vld [vmem:[#allocation6 + $0xc] ss:$16 sps:$4 sm:$0xff]   ;;  %v3035_v3 = vmov 0   ;;  %vm1424_vm0 = vcmask 1041409  }
  0xa9   : > { %746 = vmatprep.mubr.bf16.mxu0 %v3035_v3  ;;  %939 = vmatprep.mubr.bf16.mxu1 %v3035_v3  ;;  %v2632_v4 = vld [vmem:[#allocation6] ss:$16 sps:$4 sm:$0xff]   ;;  %v2633_v5 = vld [vmem:[#allocation6 + $0x8] ss:$16 sps:$4 sm:$0xff]   ;;  %v2634_v6 = vld [vmem:[#allocation6 + $0x24] ss:$16 sps:$4 sm:$0xff]  }
  0xaa   : > { %714 = vmatprep.subr.bf16.mxu0 %v2628_v1  ;;  %907 = vmatprep.subr.bf16.mxu1 %v2630_v2  ;;  %v2636_v7 = vld [vmem:[#allocation6 + $0x2c] ss:$16 sps:$4 sm:$0xff]   ;;  %v2638_v8 = vld [vmem:[#allocation6 + $0x20] ss:$16 sps:$4 sm:$0xff]   ;;  %v2639_v9 = vld [vmem:[#allocation6 + $0x28] ss:$16 sps:$4 sm:$0xff]  }
  0xab   : > { %715 = vmatpush1.bf16.msra.mxu0 %v2632_v4  ;;  %908 = vmatpush1.bf16.msra.mxu1 %v2633_v5  ;;  %v2640_v10 = vld [vmem:[#allocation6 + $0x44] ss:$16 sps:$4 sm:$0xff]   ;;  %v2642_v11 = vld [vmem:[#allocation6 + $0x4c] ss:$16 sps:$4 sm:$0xff]   ;;  %v2644_v12 = vld [vmem:[#allocation6 + $0x40] ss:$16 sps:$4 sm:$0xff]  }
  0xac   : > { %716 = vmatprep.subr.bf16.mxu0 %v2634_v6  ;;  %909 = vmatprep.subr.bf16.mxu1 %v2636_v7  ;;  %v2645_v13 = vld [vmem:[#allocation6 + $0x48] ss:$16 sps:$4 sm:$0xff]   ;;  %v2646_v14 = vld [vmem:[#allocation6 + $0x64] ss:$16 sps:$4 sm:$0xff]   ;;  %v2648_v15 = vld [vmem:[#allocation6 + $0x6c] ss:$16 sps:$4 sm:$0xff]  }
  0xad   : > { %v2650_v16 = vld [vmem:[#allocation6 + $0x60] ss:$16 sps:$4 sm:$0xff]   ;;  %v2651_v17 = vld [vmem:[#allocation6 + $0x68] ss:$16 sps:$4 sm:$0xff]   ;;  %v2652_v18 = vld [vmem:[#allocation6 + $0x84] ss:$16 sps:$4 sm:$0xff]  }
  0xae   : > { %v2654_v19 = vld [vmem:[#allocation6 + $0x8c] ss:$16 sps:$4 sm:$0xff]   ;;  %v2656_v20 = vld [vmem:[#allocation6 + $0x80] ss:$16 sps:$4 sm:$0xff]   ;;  %v2657_v21 = vld [vmem:[#allocation6 + $0x88] ss:$16 sps:$4 sm:$0xff]  }
  0xaf   : > { %717 = vmatpush1.bf16.msra.mxu0 %v2638_v8  ;;  %910 = vmatpush1.bf16.msra.mxu1 %v2639_v9  ;;  %v2658_v22 = vld [vmem:[#allocation6 + $0xa4] ss:$16 sps:$4 sm:$0xff]   ;;  %v2660_v23 = vld [vmem:[#allocation6 + $0xac] ss:$16 sps:$4 sm:$0xff]   ;;  %v2662_v24 = vld [vmem:[#allocation6 + $0xa0] ss:$16 sps:$4 sm:$0xff]  }
  0xb0   : > { %718 = vmatprep.subr.bf16.mxu0 %v2640_v10  ;;  %911 = vmatprep.subr.bf16.mxu1 %v2642_v11  ;;  %v2663_v25 = vld [vmem:[#allocation6 + $0xa8] ss:$16 sps:$4 sm:$0xff]   ;;  %v2664_v26 = vld [vmem:[#allocation6 + $0xc4] ss:$16 sps:$4 sm:$0xff]   ;;  %v2666_v27 = vld [vmem:[#allocation6 + $0xcc] ss:$16 sps:$4 sm:$0xff]  }
  0xb1   : > { %v2668_v28 = vld [vmem:[#allocation6 + $0xc0] ss:$16 sps:$4 sm:$0xff]   ;;  %v2669_v29 = vld [vmem:[#allocation6 + $0xc8] ss:$16 sps:$4 sm:$0xff]   ;;  %v2670_v30 = vld [vmem:[#allocation6 + $0xe4] ss:$16 sps:$4 sm:$0xff]  }
  0xb2   : > { %v2672_v31 = vld [vmem:[#allocation6 + $0xec] ss:$16 sps:$4 sm:$0xff]   ;;  %v2674_v32 = vld [vmem:[#allocation6 + $0xe0] ss:$16 sps:$4 sm:$0xff]   ;;  %v2675_v33 = vld [vmem:[#allocation6 + $0xe8] ss:$16 sps:$4 sm:$0xff]  }
  0xb3   : > { %719 = vmatpush1.bf16.msra.mxu0 %v2644_v12  ;;  %912 = vmatpush1.bf16.msra.mxu1 %v2645_v13  ;;  %v2676_v34 = vld [vmem:[%s3288_s23] sm:$0xff]   ;;  %v2677_v35 = vld [vmem:[%s3288_s23 + $0x8] sm:$0xff]   ;;  %v2678_v36 = vld [vmem:[%s3288_s23 + $0x10] sm:$0xff]   ;;  %vm1426_vm1 = vcmask 1042434   ;;  %vm1428_vm2 = vcmask 1043459   ;;  %vm1430_vm3 = vcmask 1044484  }
  0xb4   : > { %720 = vmatprep.subr.bf16.mxu0 %v2646_v14  ;;  %913 = vmatprep.subr.bf16.mxu1 %v2648_v15  ;;  %v2679_v37 = vld [vmem:[%s3288_s23 + $0x18] sm:$0xff]   ;;  %v2680_v38 = vld [vmem:[%s3288_s23 + $0x20] sm:$0xff]   ;;  %v2681_v39 = vld [vmem:[%s3288_s23 + $0x28] sm:$0xff]   ;;  %vm1432_vm4 = vcmask 1045509   ;;  %vm1434_vm5 = vcmask 1046534   ;;  %vm1436_vm6 = vcmask 1047559  }
  0xb5   : > { %v2682_v40 = vld [vmem:[%s3288_s23 + $0x30] sm:$0xff]   ;;  %v2683_v41 = vld [vmem:[%s3288_s23 + $0x38] sm:$0xff]   ;;  %v2684_v42 = vld [vmem:[%s3288_s23 + $0x40] sm:$0xff]   ;;  %p2367_p12 = scmp.ne.s32.totalorder %s3002_s30, 1 }
  0xb6   : > { %v2685_v43 = vld [vmem:[%s3288_s23 + $0x48] sm:$0xff]   ;;  %v2686_v44 = vld [vmem:[%s3288_s23 + $0x50] sm:$0xff]   ;;  %v2687_v45 = vld [vmem:[%s3288_s23 + $0x58] sm:$0xff]   ;;  %s3523_s22 = sld [smem:[#allocation29_spill]] (!%p2367_p12)  ;;  %s3524_s24 = sld [smem:[#allocation30_spill]] (!%p2367_p12) }
  0xb7   : > { %721 = vmatpush1.bf16.msra.mxu0 %v2650_v16  ;;  %914 = vmatpush1.bf16.msra.mxu1 %v2651_v17  ;;  %v2688_v46 = vld [vmem:[%s3288_s23 + $0x60] sm:$0xff]   ;;  %v2689_v47 = vld [vmem:[%s3288_s23 + $0x68] sm:$0xff]   ;;  %v2690_v48 = vld [vmem:[%s3288_s23 + $0x70] sm:$0xff]  }
  0xb8   : > { %722 = vmatprep.subr.bf16.mxu0 %v2652_v18  ;;  %915 = vmatprep.subr.bf16.mxu1 %v2654_v19  ;;  %v2691_v49 = vld [vmem:[%s3288_s23 + $0x78] sm:$0xff]  }
  0xbb   : > { %723 = vmatpush1.bf16.msra.mxu0 %v2656_v20  ;;  %916 = vmatpush1.bf16.msra.mxu1 %v2657_v21 }
  0xbc   : > { %724 = vmatprep.subr.bf16.mxu0 %v2658_v22  ;;  %917 = vmatprep.subr.bf16.mxu1 %v2660_v23 }
  0xbf   : > { %725 = vmatpush1.bf16.msra.mxu0 %v2662_v24  ;;  %918 = vmatpush1.bf16.msra.mxu1 %v2663_v25 }
  0xc0   : > { %726 = vmatprep.subr.bf16.mxu0 %v2664_v26  ;;  %919 = vmatprep.subr.bf16.mxu1 %v2666_v27 }
  0xc3   : > { %727 = vmatpush1.bf16.msra.mxu0 %v2668_v28  ;;  %920 = vmatpush1.bf16.msra.mxu1 %v2669_v29 }
  0xc4   : > { %728 = vmatprep.subr.bf16.mxu0 %v2670_v30  ;;  %921 = vmatprep.subr.bf16.mxu1 %v2672_v31 }
  0xc7   : > { %729 = vmatpush1.bf16.msra.mxu0 %v2674_v32  ;;  %922 = vmatpush1.bf16.msra.mxu1 %v2675_v33 }
  0xca   : > { %747 = vmatmul.mubr.bf16.vlgmr.msra.gmra.mrb[0].mxu0 %v2676_v34  ;;  %940 = vmatmul.mubr.bf16.vlgmr.msra.gmra.mrb[0].mxu1 %v2676_v34 }
  0xcb   : > { %756 = vmatprep.mubr.bf16.mxu0 %v3035_v3  ;;  %949 = vmatprep.mubr.bf16.mxu1 %v3035_v3 }
  0xd2   : > { %757 = vmatmul.mubr.bf16.gmra.mrb[4].mxu0 %v2677_v35  ;;  %950 = vmatmul.mubr.bf16.gmra.mrb[4].mxu1 %v2677_v35 }
  0xd3   : > { %766 = vmatprep.mubr.bf16.mxu0 %v3035_v3  ;;  %959 = vmatprep.mubr.bf16.mxu1 %v3035_v3 }
  0xda   : > { %767 = vmatmul.mubr.bf16.gmra.mrb[8].mxu0 %v2678_v36  ;;  %960 = vmatmul.mubr.bf16.gmra.mrb[8].mxu1 %v2678_v36 }
  0xdb   : > { %776 = vmatprep.mubr.bf16.mxu0 %v3035_v3  ;;  %969 = vmatprep.mubr.bf16.mxu1 %v3035_v3 }
  0xe2   : > { %777 = vmatmul.mubr.bf16.gmra.mrb[12].mxu0 %v2679_v37  ;;  %970 = vmatmul.mubr.bf16.gmra.mrb[12].mxu1 %v2679_v37 }
  0xe3   : > { %786 = vmatprep.mubr.bf16.mxu0 %v3035_v3  ;;  %979 = vmatprep.mubr.bf16.mxu1 %v3035_v3 }
  0xea   : > { %787 = vmatmul.mubr.bf16.gmra.mrb[16].mxu0 %v2680_v38  ;;  %980 = vmatmul.mubr.bf16.gmra.mrb[16].mxu1 %v2680_v38 }
  0xeb   : > { %796 = vmatprep.mubr.bf16.mxu0 %v3035_v3  ;;  %989 = vmatprep.mubr.bf16.mxu1 %v3035_v3 }
  0xf2   : > { %797 = vmatmul.mubr.bf16.gmra.mrb[20].mxu0 %v2681_v39  ;;  %990 = vmatmul.mubr.bf16.gmra.mrb[20].mxu1 %v2681_v39 }
  0xf3   : > { %806 = vmatprep.mubr.bf16.mxu0 %v3035_v3  ;;  %999 = vmatprep.mubr.bf16.mxu1 %v3035_v3 }
  0xfa   : > { %807 = vmatmul.mubr.bf16.gmra.mrb[24].mxu0 %v2682_v40  ;;  %1000 = vmatmul.mubr.bf16.gmra.mrb[24].mxu1 %v2682_v40 }
  0xfb   : > { %816 = vmatprep.mubr.bf16.mxu0 %v3035_v3  ;;  %1009 = vmatprep.mubr.bf16.mxu1 %v3035_v3 }
 0x102   : > { %817 = vmatmul.mubr.bf16.gmra.mrb[28].mxu0 %v2683_v41  ;;  %1010 = vmatmul.mubr.bf16.gmra.mrb[28].mxu1 %v2683_v41 }
 0x103   : > { %826 = vmatprep.mubr.bf16.mxu0 %v3035_v3  ;;  %1019 = vmatprep.mubr.bf16.mxu1 %v3035_v3 }
 0x10a   : > { %827 = vmatmul.mubr.bf16.gmra.mrb[32].mxu0 %v2684_v42  ;;  %1020 = vmatmul.mubr.bf16.gmra.mrb[32].mxu1 %v2684_v42 }
 0x10b   : > { %836 = vmatprep.mubr.bf16.mxu0 %v3035_v3  ;;  %1029 = vmatprep.mubr.bf16.mxu1 %v3035_v3 }
 0x112   : > { %837 = vmatmul.mubr.bf16.gmra.mrb[36].mxu0 %v2685_v43  ;;  %1030 = vmatmul.mubr.bf16.gmra.mrb[36].mxu1 %v2685_v43 }
 0x113   : > { %846 = vmatprep.mubr.bf16.mxu0 %v3035_v3  ;;  %1039 = vmatprep.mubr.bf16.mxu1 %v3035_v3 }
 0x11a   : > { %847 = vmatmul.mubr.bf16.gmra.mrb[40].mxu0 %v2686_v44  ;;  %1040 = vmatmul.mubr.bf16.gmra.mrb[40].mxu1 %v2686_v44 }
 0x11b   : > { %856 = vmatprep.mubr.bf16.mxu0 %v3035_v3  ;;  %1049 = vmatprep.mubr.bf16.mxu1 %v3035_v3 }
 0x122   : > { %857 = vmatmul.mubr.bf16.gmra.mrb[44].mxu0 %v2687_v45  ;;  %1050 = vmatmul.mubr.bf16.gmra.mrb[44].mxu1 %v2687_v45 }
 0x123   : > { %866 = vmatprep.mubr.bf16.mxu0 %v3035_v3  ;;  %1059 = vmatprep.mubr.bf16.mxu1 %v3035_v3 }
 0x12a   : > { %867 = vmatmul.mubr.bf16.gmra.mrb[48].mxu0 %v2688_v46  ;;  %1060 = vmatmul.mubr.bf16.gmra.mrb[48].mxu1 %v2688_v46 }
 0x12b   : > { %876 = vmatprep.mubr.bf16.mxu0 %v3035_v3  ;;  %1069 = vmatprep.mubr.bf16.mxu1 %v3035_v3 }
 0x132   : > { %877 = vmatmul.mubr.bf16.gmra.mrb[52].mxu0 %v2689_v47  ;;  %1070 = vmatmul.mubr.bf16.gmra.mrb[52].mxu1 %v2689_v47 }
 0x133   : > { %886 = vmatprep.mubr.bf16.mxu0 %v3035_v3  ;;  %1079 = vmatprep.mubr.bf16.mxu1 %v3035_v3 }
 0x13a   : > { %887 = vmatmul.mubr.bf16.gmra.mrb[56].mxu0 %v2690_v48  ;;  %1080 = vmatmul.mubr.bf16.gmra.mrb[56].mxu1 %v2690_v48 }
 0x13b   : > { %896 = vmatprep.mubr.bf16.mxu0 %v3035_v3  ;;  %1089 = vmatprep.mubr.bf16.mxu1 %v3035_v3 }
 0x142   : > { %897 = vmatmul.mubr.bf16.gmra.mrb[60].mxu0 %v2691_v49  ;;  %1090 = vmatmul.mubr.bf16.gmra.mrb[60].mxu1 %v2691_v49 }
 0x19d   : > { %v748_v50 = vpop.f32.mrb[0].mxu0  ;;  %v941_v51 = vpop.f32.mrb[0].mxu1 }
 0x19e   : > { %v750_v52 = vpop.f32.mrb[1].mxu0  ;;  %v943_v53 = vpop.f32.mrb[1].mxu1 }
 0x19f   : > { %v752_v54 = vpop.f32.mrb[2].mxu0  ;;  %v945_v55 = vpop.f32.mrb[2].mxu1 }
 0x1a0   : > { %v1104_v56 = vadd.f32 %v752_v54, %v748_v50  ;;  %v1122_v57 = vadd.f32 %v945_v55, %v941_v51  ;;  %v754_v58 = vpop.f32.mrb[3].mxu0  ;;  %v947_v59 = vpop.f32.mrb[3].mxu1 }
 0x1a1   : > { %v1113_v60 = vadd.f32 %v754_v58, %v750_v52  ;;  %v1131_v61 = vadd.f32 %v947_v59, %v943_v53 }
 0x1a5   : > { %v758_v62 = vpop.f32.mrb[4].mxu0  ;;  %v951_v63 = vpop.f32.mrb[4].mxu1 }
 0x1a6   : > { %v1105_v0 = vadd.f32 %v1104_v56, %v758_v62  ;;  %v1123_v1 = vadd.f32 %v1122_v57, %v951_v63  ;;  %v760_v2 = vpop.f32.mrb[5].mxu0  ;;  %v953_v3 = vpop.f32.mrb[5].mxu1 }
 0x1a7   : > { %v1114_v4 = vadd.f32 %v1113_v60, %v760_v2  ;;  %v1132_v5 = vadd.f32 %v1131_v61, %v953_v3  ;;  %v762_v6 = vpop.f32.mrb[6].mxu0  ;;  %v955_v7 = vpop.f32.mrb[6].mxu1 }
 0x1a8   : > { %v1106_v8 = vadd.f32 %v1105_v0, %v762_v6  ;;  %v1124_v9 = vadd.f32 %v1123_v1, %v955_v7  ;;  %v764_v10 = vpop.f32.mrb[7].mxu0  ;;  %v957_v11 = vpop.f32.mrb[7].mxu1 }
 0x1a9   : > { %v1115_v12 = vadd.f32 %v1114_v4, %v764_v10  ;;  %v1133_v13 = vadd.f32 %v1132_v5, %v957_v11 }
 0x1aa   : > { %v1107_v16 = vrot.slane %v1106_v8, 4  ;;  %v1125_v17 = vrot.slane %v1124_v9, 4 }
 0x1ab   : > { %v1116_v20 = vrot.slane %v1115_v12, 4  ;;  %v1134_v21 = vrot.slane %v1133_v13, 4 }
 0x1ac   : > { %v1108_v30 = vadd.f32 %v1107_v16, %v1106_v8  ;;  %v1126_v31 = vadd.f32 %v1125_v17, %v1124_v9 }
 0x1ad   : > { %v768_v14 = vpop.f32.mrb[8].mxu0  ;;  %v961_v15 = vpop.f32.mrb[8].mxu1  ;;  %v1117_v32 = vadd.f32 %v1116_v20, %v1115_v12  ;;  %v1135_v33 = vadd.f32 %v1134_v21, %v1133_v13 }
 0x1ae   : > { %v770_v18 = vpop.f32.mrb[9].mxu0  ;;  %v963_v19 = vpop.f32.mrb[9].mxu1  ;;  %v1109_v36 = vrot.slane %v1108_v30, 2  ;;  %v1127_v37 = vrot.slane %v1126_v31, 2 }
 0x1af   : > { %v772_v22 = vpop.f32.mrb[10].mxu0  ;;  %v965_v23 = vpop.f32.mrb[10].mxu1  ;;  %v1118_v42 = vrot.slane %v1117_v32, 2  ;;  %v1136_v43 = vrot.slane %v1135_v33, 2 }
 0x1b0   : > { %v1140_v24 = vadd.f32 %v772_v22, %v768_v14  ;;  %v1158_v25 = vadd.f32 %v965_v23, %v961_v15  ;;  %v774_v26 = vpop.f32.mrb[11].mxu0  ;;  %v967_v27 = vpop.f32.mrb[11].mxu1  ;;  %v1110_v54 = vadd.f32 %v1109_v36, %v1108_v30  ;;  %v1128_v55 = vadd.f32 %v1127_v37, %v1126_v31 }
 0x1b1   : > { %v1149_v28 = vadd.f32 %v774_v26, %v770_v18  ;;  %v1167_v29 = vadd.f32 %v967_v27, %v963_v19  ;;  %v1119_v58 = vadd.f32 %v1118_v42, %v1117_v32  ;;  %v1137_v59 = vadd.f32 %v1136_v43, %v1135_v33 }
 0x1b2   : > { %v1111_v4 = vrot.slane %v1110_v54, 1  ;;  %v1129_v5 = vrot.slane %v1128_v55, 1 }
 0x1b3   : > { %v1120_v10 = vrot.slane %v1119_v58, 1  ;;  %v1138_v11 = vrot.slane %v1137_v59, 1 }
 0x1b4   : > { %v1112_v30 = vadd.f32 %v1111_v4, %v1110_v54  ;;  %v1130_v31 = vadd.f32 %v1129_v5, %v1128_v55 }
 0x1b5   : > { %v778_v34 = vpop.f32.mrb[12].mxu0  ;;  %v971_v35 = vpop.f32.mrb[12].mxu1 }
 0x1b6   : > { %v1141_v38 = vadd.f32 %v1140_v24, %v778_v34  ;;  %v1159_v39 = vadd.f32 %v1158_v25, %v971_v35  ;;  %v780_v40 = vpop.f32.mrb[13].mxu0  ;;  %v973_v41 = vpop.f32.mrb[13].mxu1  ;;  %v1121_v34 = vadd.f32 %v1120_v10, %v1119_v58  ;;  %v1139_v35 = vadd.f32 %v1138_v11, %v1137_v59 }
 0x1b7   : > { %v1150_v44 = vadd.f32 %v1149_v28, %v780_v40  ;;  %v1168_v45 = vadd.f32 %v1167_v29, %v973_v41  ;;  %v782_v46 = vpop.f32.mrb[14].mxu0  ;;  %v975_v47 = vpop.f32.mrb[14].mxu1 }
 0x1b8   : > { %v1142_v48 = vadd.f32 %v1141_v38, %v782_v46  ;;  %v1160_v49 = vadd.f32 %v1159_v39, %v975_v47  ;;  %v784_v50 = vpop.f32.mrb[15].mxu0  ;;  %v977_v51 = vpop.f32.mrb[15].mxu1 }
 0x1b9   : > { %v1151_v52 = vadd.f32 %v1150_v44, %v784_v50  ;;  %v1169_v53 = vadd.f32 %v1168_v45, %v977_v51 }
 0x1ba   : > { %v1143_v56 = vrot.slane %v1142_v48, 4  ;;  %v1161_v57 = vrot.slane %v1160_v49, 4 }
 0x1bb   : > { %v1152_v60 = vrot.slane %v1151_v52, 4  ;;  %v1170_v61 = vrot.slane %v1169_v53, 4 }
 0x1bc   : > { %v1144_v62 = vadd.f32 %v1143_v56, %v1142_v48  ;;  %v1162_v63 = vadd.f32 %v1161_v57, %v1160_v49 }
 0x1bd   : > { %v1153_v0 = vadd.f32 %v1152_v60, %v1151_v52  ;;  %v1171_v1 = vadd.f32 %v1170_v61, %v1169_v53  ;;  %v788_v2 = vpop.f32.mrb[16].mxu0  ;;  %v981_v3 = vpop.f32.mrb[16].mxu1 }
 0x1be   : > { %v1145_v6 = vrot.slane %v1144_v62, 2  ;;  %v1163_v7 = vrot.slane %v1162_v63, 2  ;;  %v790_v8 = vpop.f32.mrb[17].mxu0  ;;  %v983_v9 = vpop.f32.mrb[17].mxu1 }
 0x1bf   : > { %v1154_v12 = vrot.slane %v1153_v0, 2  ;;  %v1172_v13 = vrot.slane %v1171_v1, 2  ;;  %v792_v14 = vpop.f32.mrb[18].mxu0  ;;  %v985_v15 = vpop.f32.mrb[18].mxu1 }
 0x1c0   : > { %v1146_v16 = vadd.f32 %v1145_v6, %v1144_v62  ;;  %v1164_v17 = vadd.f32 %v1163_v7, %v1162_v63  ;;  %v1176_v18 = vadd.f32 %v792_v14, %v788_v2  ;;  %v1194_v19 = vadd.f32 %v985_v15, %v981_v3  ;;  %v794_v20 = vpop.f32.mrb[19].mxu0  ;;  %v987_v21 = vpop.f32.mrb[19].mxu1 }
 0x1c1   : > { %v1155_v22 = vadd.f32 %v1154_v12, %v1153_v0  ;;  %v1173_v23 = vadd.f32 %v1172_v13, %v1171_v1  ;;  %v1185_v24 = vadd.f32 %v794_v20, %v790_v8  ;;  %v1203_v25 = vadd.f32 %v987_v21, %v983_v9 }
 0x1c2   : > { %v1147_v26 = vrot.slane %v1146_v16, 1  ;;  %v1165_v27 = vrot.slane %v1164_v17, 1 }
 0x1c3   : > { %v1156_v28 = vrot.slane %v1155_v22, 1  ;;  %v1174_v29 = vrot.slane %v1173_v23, 1 }
 0x1c4   : > { %v1148_v32 = vadd.f32 %v1147_v26, %v1146_v16  ;;  %v1166_v33 = vadd.f32 %v1165_v27, %v1164_v17 }
 0x1c5   : > { %v1157_v36 = vadd.f32 %v1156_v28, %v1155_v22  ;;  %v1175_v37 = vadd.f32 %v1174_v29, %v1173_v23  ;;  %v798_v38 = vpop.f32.mrb[20].mxu0  ;;  %v991_v39 = vpop.f32.mrb[20].mxu1 }
 0x1c6   : > { %v1425_v40 = vsel %vm1424_vm0, %v1148_v32, %v1112_v30  ;;  %v1445_v41 = vsel %vm1424_vm0, %v1166_v33, %v1130_v31  ;;  %v1177_v42 = vadd.f32 %v1176_v18, %v798_v38  ;;  %v1195_v43 = vadd.f32 %v1194_v19, %v991_v39  ;;  %v800_v44 = vpop.f32.mrb[21].mxu0  ;;  %v993_v45 = vpop.f32.mrb[21].mxu1 }
 0x1c7   : > { %v1438_v46 = vsel %vm1424_vm0, %v1157_v36, %v1121_v34  ;;  %v1452_v47 = vsel %vm1424_vm0, %v1175_v37, %v1139_v35  ;;  %v1186_v48 = vadd.f32 %v1185_v24, %v800_v44  ;;  %v1204_v49 = vadd.f32 %v1203_v25, %v993_v45  ;;  %v802_v50 = vpop.f32.mrb[22].mxu0  ;;  %v995_v51 = vpop.f32.mrb[22].mxu1 }
 0x1c8   : > { %v1178_v52 = vadd.f32 %v1177_v42, %v802_v50  ;;  %v1196_v53 = vadd.f32 %v1195_v43, %v995_v51  ;;  %v804_v54 = vpop.f32.mrb[23].mxu0  ;;  %v997_v55 = vpop.f32.mrb[23].mxu1 }
 0x1c9   : > { %v1187_v56 = vadd.f32 %v1186_v48, %v804_v54  ;;  %v1205_v57 = vadd.f32 %v1204_v49, %v997_v55 }
 0x1ca   : > { %v1179_v58 = vrot.slane %v1178_v52, 4  ;;  %v1197_v59 = vrot.slane %v1196_v53, 4 }
 0x1cb   : > { %v1188_v60 = vrot.slane %v1187_v56, 4  ;;  %v1206_v61 = vrot.slane %v1205_v57, 4 }
 0x1cc   : > { %v1180_v62 = vadd.f32 %v1179_v58, %v1178_v52  ;;  %v1198_v63 = vadd.f32 %v1197_v59, %v1196_v53 }
 0x1cd   : > { %v1189_v0 = vadd.f32 %v1188_v60, %v1187_v56  ;;  %v1207_v1 = vadd.f32 %v1206_v61, %v1205_v57  ;;  %v808_v2 = vpop.f32.mrb[24].mxu0  ;;  %v1001_v3 = vpop.f32.mrb[24].mxu1 }
 0x1ce   : > { %v1181_v4 = vrot.slane %v1180_v62, 2  ;;  %v1199_v5 = vrot.slane %v1198_v63, 2  ;;  %v810_v6 = vpop.f32.mrb[25].mxu0  ;;  %v1003_v7 = vpop.f32.mrb[25].mxu1 }
 0x1cf   : > { %v1190_v8 = vrot.slane %v1189_v0, 2  ;;  %v1208_v9 = vrot.slane %v1207_v1, 2  ;;  %v812_v10 = vpop.f32.mrb[26].mxu0  ;;  %v1005_v11 = vpop.f32.mrb[26].mxu1 }
 0x1d0   : > { %v1182_v12 = vadd.f32 %v1181_v4, %v1180_v62  ;;  %v1200_v13 = vadd.f32 %v1199_v5, %v1198_v63  ;;  %v1212_v14 = vadd.f32 %v812_v10, %v808_v2  ;;  %v1230_v15 = vadd.f32 %v1005_v11, %v1001_v3  ;;  %v814_v16 = vpop.f32.mrb[27].mxu0  ;;  %v1007_v17 = vpop.f32.mrb[27].mxu1 }
 0x1d1   : > { %v1191_v18 = vadd.f32 %v1190_v8, %v1189_v0  ;;  %v1209_v19 = vadd.f32 %v1208_v9, %v1207_v1  ;;  %v1221_v20 = vadd.f32 %v814_v16, %v810_v6  ;;  %v1239_v21 = vadd.f32 %v1007_v17, %v1003_v7 }
 0x1d2   : > { %v1183_v22 = vrot.slane %v1182_v12, 1  ;;  %v1201_v23 = vrot.slane %v1200_v13, 1 }
 0x1d3   : > { %v1192_v24 = vrot.slane %v1191_v18, 1  ;;  %v1210_v25 = vrot.slane %v1209_v19, 1 }
 0x1d4   : > { %v1184_v26 = vadd.f32 %v1183_v22, %v1182_v12  ;;  %v1202_v27 = vadd.f32 %v1201_v23, %v1200_v13 }
 0x1d5   : > { %v1193_v28 = vadd.f32 %v1192_v24, %v1191_v18  ;;  %v1211_v29 = vadd.f32 %v1210_v25, %v1209_v19  ;;  %v818_v30 = vpop.f32.mrb[28].mxu0  ;;  %v1011_v31 = vpop.f32.mrb[28].mxu1 }
 0x1d6   : > { %v1427_v32 = vsel %vm1426_vm1, %v1184_v26, %v1425_v40  ;;  %v1446_v33 = vsel %vm1426_vm1, %v1202_v27, %v1445_v41  ;;  %v1213_v34 = vadd.f32 %v1212_v14, %v818_v30  ;;  %v1231_v35 = vadd.f32 %v1230_v15, %v1011_v31  ;;  %v820_v36 = vpop.f32.mrb[29].mxu0  ;;  %v1013_v37 = vpop.f32.mrb[29].mxu1 }
 0x1d7   : > { %v1439_v38 = vsel %vm1426_vm1, %v1193_v28, %v1438_v46  ;;  %v1453_v39 = vsel %vm1426_vm1, %v1211_v29, %v1452_v47  ;;  %v1222_v42 = vadd.f32 %v1221_v20, %v820_v36  ;;  %v1240_v43 = vadd.f32 %v1239_v21, %v1013_v37  ;;  %v822_v44 = vpop.f32.mrb[30].mxu0  ;;  %v1015_v45 = vpop.f32.mrb[30].mxu1 }
 0x1d8   : > { %v1214_v48 = vadd.f32 %v1213_v34, %v822_v44  ;;  %v1232_v49 = vadd.f32 %v1231_v35, %v1015_v45  ;;  %v824_v50 = vpop.f32.mrb[31].mxu0  ;;  %v1017_v51 = vpop.f32.mrb[31].mxu1 }
 0x1d9   : > { %v1223_v52 = vadd.f32 %v1222_v42, %v824_v50  ;;  %v1241_v40 = vadd.f32 %v1240_v43, %v1017_v51 }
 0x1da   : > { %v1215_v53 = vrot.slane %v1214_v48, 4  ;;  %v1233_v41 = vrot.slane %v1232_v49, 4 }
 0x1db   : > { %v1224_v54 = vrot.slane %v1223_v52, 4  ;;  %v1242_v55 = vrot.slane %v1241_v40, 4 }
 0x1dc   : > { %v1216_v56 = vadd.f32 %v1215_v53, %v1214_v48  ;;  %v1234_v57 = vadd.f32 %v1233_v41, %v1232_v49 }
 0x1dd   : > { %v1225_v58 = vadd.f32 %v1224_v54, %v1223_v52  ;;  %v1243_v46 = vadd.f32 %v1242_v55, %v1241_v40  ;;  %v828_v59 = vpop.f32.mrb[32].mxu0  ;;  %v1021_v47 = vpop.f32.mrb[32].mxu1 }
 0x1de   : > { %v1217_v60 = vrot.slane %v1216_v56, 2  ;;  %v1235_v61 = vrot.slane %v1234_v57, 2  ;;  %v830_v62 = vpop.f32.mrb[33].mxu0  ;;  %v1023_v63 = vpop.f32.mrb[33].mxu1 }
 0x1df   : > { %v1226_v0 = vrot.slane %v1225_v58, 2  ;;  %v1244_v1 = vrot.slane %v1243_v46, 2  ;;  %v832_v2 = vpop.f32.mrb[34].mxu0  ;;  %v1025_v3 = vpop.f32.mrb[34].mxu1 }
 0x1e0   : > { %v1218_v4 = vadd.f32 %v1217_v60, %v1216_v56  ;;  %v1236_v5 = vadd.f32 %v1235_v61, %v1234_v57  ;;  %v1248_v6 = vadd.f32 %v832_v2, %v828_v59  ;;  %v1266_v7 = vadd.f32 %v1025_v3, %v1021_v47  ;;  %v834_v8 = vpop.f32.mrb[35].mxu0  ;;  %v1027_v9 = vpop.f32.mrb[35].mxu1 }
 0x1e1   : > { %v1227_v10 = vadd.f32 %v1226_v0, %v1225_v58  ;;  %v1245_v11 = vadd.f32 %v1244_v1, %v1243_v46  ;;  %v1257_v12 = vadd.f32 %v834_v8, %v830_v62  ;;  %v1275_v13 = vadd.f32 %v1027_v9, %v1023_v63 }
 0x1e2   : > { %v1219_v14 = vrot.slane %v1218_v4, 1  ;;  %v1237_v15 = vrot.slane %v1236_v5, 1 }
 0x1e3   : > { %v1228_v16 = vrot.slane %v1227_v10, 1  ;;  %v1246_v17 = vrot.slane %v1245_v11, 1 }
 0x1e4   : > { %v1220_v18 = vadd.f32 %v1219_v14, %v1218_v4  ;;  %v1238_v19 = vadd.f32 %v1237_v15, %v1236_v5 }
 0x1e5   : > { %v1229_v20 = vadd.f32 %v1228_v16, %v1227_v10  ;;  %v1247_v21 = vadd.f32 %v1246_v17, %v1245_v11  ;;  %v838_v22 = vpop.f32.mrb[36].mxu0  ;;  %v1031_v23 = vpop.f32.mrb[36].mxu1 }
 0x1e6   : > { %v1429_v24 = vsel %vm1428_vm2, %v1220_v18, %v1427_v32  ;;  %v1447_v25 = vsel %vm1428_vm2, %v1238_v19, %v1446_v33  ;;  %v1249_v26 = vadd.f32 %v1248_v6, %v838_v22  ;;  %v1267_v27 = vadd.f32 %v1266_v7, %v1031_v23  ;;  %v840_v28 = vpop.f32.mrb[37].mxu0  ;;  %v1033_v29 = vpop.f32.mrb[37].mxu1 }
 0x1e7   : > { %v1440_v30 = vsel %vm1428_vm2, %v1229_v20, %v1439_v38  ;;  %v1454_v31 = vsel %vm1428_vm2, %v1247_v21, %v1453_v39  ;;  %v1258_v34 = vadd.f32 %v1257_v12, %v840_v28  ;;  %v1276_v35 = vadd.f32 %v1275_v13, %v1033_v29  ;;  %v842_v36 = vpop.f32.mrb[38].mxu0  ;;  %v1035_v37 = vpop.f32.mrb[38].mxu1 }
 0x1e8   : > { %v1250_v42 = vadd.f32 %v1249_v26, %v842_v36  ;;  %v1268_v43 = vadd.f32 %v1267_v27, %v1035_v37  ;;  %v844_v44 = vpop.f32.mrb[39].mxu0  ;;  %v1037_v45 = vpop.f32.mrb[39].mxu1 }
 0x1e9   : > { %v1259_v48 = vadd.f32 %v1258_v34, %v844_v44  ;;  %v1277_v32 = vadd.f32 %v1276_v35, %v1037_v45 }
 0x1ea   : > { %v1251_v49 = vrot.slane %v1250_v42, 4  ;;  %v1269_v33 = vrot.slane %v1268_v43, 4 }
 0x1eb   : > { %v1260_v50 = vrot.slane %v1259_v48, 4  ;;  %v1278_v51 = vrot.slane %v1277_v32, 4 }
 0x1ec   : > { %v1252_v52 = vadd.f32 %v1251_v49, %v1250_v42  ;;  %v1270_v40 = vadd.f32 %v1269_v33, %v1268_v43 }
 0x1ed   : > { %v1261_v53 = vadd.f32 %v1260_v50, %v1259_v48  ;;  %v1279_v38 = vadd.f32 %v1278_v51, %v1277_v32  ;;  %v848_v41 = vpop.f32.mrb[40].mxu0  ;;  %v1041_v39 = vpop.f32.mrb[40].mxu1 }
 0x1ee   : > { %v1253_v54 = vrot.slane %v1252_v52, 2  ;;  %v1271_v55 = vrot.slane %v1270_v40, 2  ;;  %v850_v56 = vpop.f32.mrb[41].mxu0  ;;  %v1043_v57 = vpop.f32.mrb[41].mxu1 }
 0x1ef   : > { %v1262_v58 = vrot.slane %v1261_v53, 2  ;;  %v1280_v46 = vrot.slane %v1279_v38, 2  ;;  %v852_v59 = vpop.f32.mrb[42].mxu0  ;;  %v1045_v47 = vpop.f32.mrb[42].mxu1 }
 0x1f0   : > { %v1254_v60 = vadd.f32 %v1253_v54, %v1252_v52  ;;  %v1272_v61 = vadd.f32 %v1271_v55, %v1270_v40  ;;  %v1284_v62 = vadd.f32 %v852_v59, %v848_v41  ;;  %v1302_v63 = vadd.f32 %v1045_v47, %v1041_v39  ;;  %v854_v0 = vpop.f32.mrb[43].mxu0  ;;  %v1047_v1 = vpop.f32.mrb[43].mxu1 }
 0x1f1   : > { %v1263_v2 = vadd.f32 %v1262_v58, %v1261_v53  ;;  %v1281_v3 = vadd.f32 %v1280_v46, %v1279_v38  ;;  %v1293_v4 = vadd.f32 %v854_v0, %v850_v56  ;;  %v1311_v5 = vadd.f32 %v1047_v1, %v1043_v57 }
 0x1f2   : > { %v1255_v6 = vrot.slane %v1254_v60, 1  ;;  %v1273_v7 = vrot.slane %v1272_v61, 1 }
 0x1f3   : > { %v1264_v8 = vrot.slane %v1263_v2, 1  ;;  %v1282_v9 = vrot.slane %v1281_v3, 1 }
 0x1f4   : > { %v1256_v10 = vadd.f32 %v1255_v6, %v1254_v60  ;;  %v1274_v11 = vadd.f32 %v1273_v7, %v1272_v61 }
 0x1f5   : > { %v1265_v12 = vadd.f32 %v1264_v8, %v1263_v2  ;;  %v1283_v13 = vadd.f32 %v1282_v9, %v1281_v3  ;;  %v858_v14 = vpop.f32.mrb[44].mxu0  ;;  %v1051_v15 = vpop.f32.mrb[44].mxu1 }
 0x1f6   : > { %v1431_v16 = vsel %vm1430_vm3, %v1256_v10, %v1429_v24  ;;  %v1448_v17 = vsel %vm1430_vm3, %v1274_v11, %v1447_v25  ;;  %v1285_v18 = vadd.f32 %v1284_v62, %v858_v14  ;;  %v1303_v19 = vadd.f32 %v1302_v63, %v1051_v15  ;;  %v860_v20 = vpop.f32.mrb[45].mxu0  ;;  %v1053_v21 = vpop.f32.mrb[45].mxu1 }
 0x1f7   : > { %v1441_v22 = vsel %vm1430_vm3, %v1265_v12, %v1440_v30  ;;  %v1455_v23 = vsel %vm1430_vm3, %v1283_v13, %v1454_v31  ;;  %v1294_v26 = vadd.f32 %v1293_v4, %v860_v20  ;;  %v1312_v27 = vadd.f32 %v1311_v5, %v1053_v21  ;;  %v862_v28 = vpop.f32.mrb[46].mxu0  ;;  %v1055_v29 = vpop.f32.mrb[46].mxu1 }
 0x1f8   : > { %v1286_v34 = vadd.f32 %v1285_v18, %v862_v28  ;;  %v1304_v35 = vadd.f32 %v1303_v19, %v1055_v29  ;;  %v864_v36 = vpop.f32.mrb[47].mxu0  ;;  %v1057_v37 = vpop.f32.mrb[47].mxu1 }
 0x1f9   : > { %v1295_v42 = vadd.f32 %v1294_v26, %v864_v36  ;;  %v1313_v24 = vadd.f32 %v1312_v27, %v1057_v37 }
 0x1fa   : > { %v1287_v43 = vrot.slane %v1286_v34, 4  ;;  %v1305_v25 = vrot.slane %v1304_v35, 4 }
 0x1fb   : > { %v1296_v44 = vrot.slane %v1295_v42, 4  ;;  %v1314_v45 = vrot.slane %v1313_v24, 4 }
 0x1fc   : > { %v1288_v48 = vadd.f32 %v1287_v43, %v1286_v34  ;;  %v1306_v32 = vadd.f32 %v1305_v25, %v1304_v35 }
 0x1fd   : > { %v1297_v49 = vadd.f32 %v1296_v44, %v1295_v42  ;;  %v1315_v30 = vadd.f32 %v1314_v45, %v1313_v24  ;;  %v868_v33 = vpop.f32.mrb[48].mxu0  ;;  %v1061_v31 = vpop.f32.mrb[48].mxu1 }
 0x1fe   : > { %v1289_v50 = vrot.slane %v1288_v48, 2  ;;  %v1307_v51 = vrot.slane %v1306_v32, 2  ;;  %v870_v52 = vpop.f32.mrb[49].mxu0  ;;  %v1063_v40 = vpop.f32.mrb[49].mxu1 }
 0x1ff   : > { %v1298_v53 = vrot.slane %v1297_v49, 2  ;;  %v1316_v38 = vrot.slane %v1315_v30, 2  ;;  %v872_v41 = vpop.f32.mrb[50].mxu0  ;;  %v1065_v39 = vpop.f32.mrb[50].mxu1 }
 0x200   : > { %v1290_v54 = vadd.f32 %v1289_v50, %v1288_v48  ;;  %v1308_v55 = vadd.f32 %v1307_v51, %v1306_v32  ;;  %v1320_v56 = vadd.f32 %v872_v41, %v868_v33  ;;  %v1338_v57 = vadd.f32 %v1065_v39, %v1061_v31  ;;  %v874_v58 = vpop.f32.mrb[51].mxu0  ;;  %v1067_v46 = vpop.f32.mrb[51].mxu1 }
 0x201   : > { %v1299_v59 = vadd.f32 %v1298_v53, %v1297_v49  ;;  %v1317_v47 = vadd.f32 %v1316_v38, %v1315_v30  ;;  %v1329_v60 = vadd.f32 %v874_v58, %v870_v52  ;;  %v1347_v61 = vadd.f32 %v1067_v46, %v1063_v40 }
 0x202   : > { %v1291_v62 = vrot.slane %v1290_v54, 1  ;;  %v1309_v63 = vrot.slane %v1308_v55, 1 }
 0x203   : > { %v1300_v0 = vrot.slane %v1299_v59, 1  ;;  %v1318_v1 = vrot.slane %v1317_v47, 1 }
 0x204   : > { %v1292_v2 = vadd.f32 %v1291_v62, %v1290_v54  ;;  %v1310_v3 = vadd.f32 %v1309_v63, %v1308_v55 }
 0x205   : > { %v1301_v4 = vadd.f32 %v1300_v0, %v1299_v59  ;;  %v1319_v5 = vadd.f32 %v1318_v1, %v1317_v47  ;;  %v878_v6 = vpop.f32.mrb[52].mxu0  ;;  %v1071_v7 = vpop.f32.mrb[52].mxu1 }
 0x206   : > { %v1433_v8 = vsel %vm1432_vm4, %v1292_v2, %v1431_v16  ;;  %v1449_v9 = vsel %vm1432_vm4, %v1310_v3, %v1448_v17  ;;  %v1321_v10 = vadd.f32 %v1320_v56, %v878_v6  ;;  %v1339_v11 = vadd.f32 %v1338_v57, %v1071_v7  ;;  %v880_v12 = vpop.f32.mrb[53].mxu0  ;;  %v1073_v13 = vpop.f32.mrb[53].mxu1 }
 0x207   : > { %v1442_v14 = vsel %vm1432_vm4, %v1301_v4, %v1441_v22  ;;  %v1456_v15 = vsel %vm1432_vm4, %v1319_v5, %v1455_v23  ;;  %v1330_v18 = vadd.f32 %v1329_v60, %v880_v12  ;;  %v1348_v19 = vadd.f32 %v1347_v61, %v1073_v13  ;;  %v882_v20 = vpop.f32.mrb[54].mxu0  ;;  %v1075_v21 = vpop.f32.mrb[54].mxu1 }
 0x208   : > { %v1322_v26 = vadd.f32 %v1321_v10, %v882_v20  ;;  %v1340_v27 = vadd.f32 %v1339_v11, %v1075_v21  ;;  %v884_v28 = vpop.f32.mrb[55].mxu0  ;;  %v1077_v29 = vpop.f32.mrb[55].mxu1 }
 0x209   : > { %v1331_v34 = vadd.f32 %v1330_v18, %v884_v28  ;;  %v1349_v16 = vadd.f32 %v1348_v19, %v1077_v29 }
 0x20a   : > { %v1323_v35 = vrot.slane %v1322_v26, 4  ;;  %v1341_v17 = vrot.slane %v1340_v27, 4 }
 0x20b   : > { %v1332_v36 = vrot.slane %v1331_v34, 4  ;;  %v1350_v37 = vrot.slane %v1349_v16, 4 }
 0x20c   : > { %v1324_v42 = vadd.f32 %v1323_v35, %v1322_v26  ;;  %v1342_v24 = vadd.f32 %v1341_v17, %v1340_v27 }
 0x20d   : > { %v1333_v43 = vadd.f32 %v1332_v36, %v1331_v34  ;;  %v1351_v22 = vadd.f32 %v1350_v37, %v1349_v16  ;;  %v888_v25 = vpop.f32.mrb[56].mxu0  ;;  %v1081_v23 = vpop.f32.mrb[56].mxu1 }
 0x20e   : > { %v1325_v44 = vrot.slane %v1324_v42, 2  ;;  %v1343_v45 = vrot.slane %v1342_v24, 2  ;;  %v890_v48 = vpop.f32.mrb[57].mxu0  ;;  %v1083_v32 = vpop.f32.mrb[57].mxu1 }
 0x20f   : > { %v1334_v49 = vrot.slane %v1333_v43, 2  ;;  %v1352_v30 = vrot.slane %v1351_v22, 2  ;;  %v892_v33 = vpop.f32.mrb[58].mxu0  ;;  %v1085_v31 = vpop.f32.mrb[58].mxu1 }
 0x210   : > { %v1326_v50 = vadd.f32 %v1325_v44, %v1324_v42  ;;  %v1344_v51 = vadd.f32 %v1343_v45, %v1342_v24  ;;  %v1356_v52 = vadd.f32 %v892_v33, %v888_v25  ;;  %v1374_v40 = vadd.f32 %v1085_v31, %v1081_v23  ;;  %v894_v53 = vpop.f32.mrb[59].mxu0  ;;  %v1087_v38 = vpop.f32.mrb[59].mxu1  ;;  %v1101_v33 = vld [vmem:[#allocation2 + $0x8] sm:$0xff] }
 0x211   : > { %v1335_v41 = vadd.f32 %v1334_v49, %v1333_v43  ;;  %v1353_v39 = vadd.f32 %v1352_v30, %v1351_v22  ;;  %v1365_v54 = vadd.f32 %v894_v53, %v890_v48  ;;  %v1383_v55 = vadd.f32 %v1087_v38, %v1083_v32  ;;  %v1100_v48 = vld [vmem:[#allocation2] sm:$0xff]  ;;  %v1102_v49 = vld [vmem:[#allocation2 + $0x10] sm:$0xff] }
 0x212   : > { %v1327_v56 = vrot.slane %v1326_v50, 1  ;;  %v1345_v57 = vrot.slane %v1344_v51, 1 }
 0x213   : > { %v1336_v58 = vrot.slane %v1335_v41, 1  ;;  %v1354_v46 = vrot.slane %v1353_v39, 1 }
 0x214   : > { %v1328_v59 = vadd.f32 %v1327_v56, %v1326_v50  ;;  %v1346_v47 = vadd.f32 %v1345_v57, %v1344_v51  ;;  %v1103_v50 = vld [vmem:[#allocation2 + $0x18] sm:$0xff]  ;;  %v2692_v56 = vld [vmem:[#allocation8 + $0x4] ss:$8 sps:$4 sm:$0xff] (!%p2367_p12)  }
 0x215   : > { %v1337_v60 = vadd.f32 %v1336_v58, %v1335_v41  ;;  %v1355_v61 = vadd.f32 %v1354_v46, %v1353_v39  ;;  %v898_v62 = vpop.f32.mrb[60].mxu0  ;;  %v1091_v63 = vpop.f32.mrb[60].mxu1  ;;  %v2694_v57 = vld [vmem:[#allocation8 + $0x104] ss:$8 sps:$4 sm:$0xff] (!%p2367_p12)   ;;  %1909 = vmatprep.subr.bf16.mxu1 (!%p2367_p12), %v2692_v56  ;;  %v2696_v58 = vld [vmem:[#allocation8] ss:$8 sps:$4 sm:$0xff] (!%p2367_p12)  }
 0x216   : > { %v1435_v0 = vsel %vm1434_vm5, %v1328_v59, %v1433_v8  ;;  %v1450_v1 = vsel %vm1434_vm5, %v1346_v47, %v1449_v9  ;;  %v1357_v2 = vadd.f32 %v1356_v52, %v898_v62  ;;  %v1375_v3 = vadd.f32 %v1374_v40, %v1091_v63  ;;  %v900_v4 = vpop.f32.mrb[61].mxu0  ;;  %v1093_v5 = vpop.f32.mrb[61].mxu1  ;;  %v2697_v46 = vld [vmem:[#allocation8 + $0x100] ss:$8 sps:$4 sm:$0xff] (!%p2367_p12)   ;;  %1950 = vmatprep.subr.bf16.mxu0 (!%p2367_p12), %v2694_v57  ;;  %v2698_v59 = vld [vmem:[#allocation8 + $0x14] ss:$8 sps:$4 sm:$0xff] (!%p2367_p12)  }
 0x217   : > { %v1443_v6 = vsel %vm1434_vm5, %v1337_v60, %v1442_v14  ;;  %v1457_v7 = vsel %vm1434_vm5, %v1355_v61, %v1456_v15  ;;  %v1366_v10 = vadd.f32 %v1365_v54, %v900_v4  ;;  %v1384_v11 = vadd.f32 %v1383_v55, %v1093_v5  ;;  %v902_v12 = vpop.f32.mrb[62].mxu0  ;;  %v1095_v13 = vpop.f32.mrb[62].mxu1  ;;  %1910 = vmatpush1.bf16.msra.mxu1 (!%p2367_p12), %v2696_v58  ;;  %v2700_v47 = vld [vmem:[#allocation8 + $0x114] ss:$8 sps:$4 sm:$0xff] (!%p2367_p12)   ;;  %v2702_v60 = vld [vmem:[#allocation8 + $0x10] ss:$8 sps:$4 sm:$0xff] (!%p2367_p12)  }
 0x218   : > { %v1358_v18 = vadd.f32 %v1357_v2, %v902_v12  ;;  %v1376_v19 = vadd.f32 %v1375_v3, %v1095_v13  ;;  %v904_v20 = vpop.f32.mrb[63].mxu0  ;;  %v1097_v21 = vpop.f32.mrb[63].mxu1  ;;  %1951 = vmatpush1.bf16.msra.mxu0 (!%p2367_p12), %v2697_v46  ;;  %1911 = vmatprep.subr.bf16.mxu1 (!%p2367_p12), %v2698_v59  ;;  %v2703_v61 = vld [vmem:[#allocation8 + $0x110] ss:$8 sps:$4 sm:$0xff] (!%p2367_p12)   ;;  %v2704_v62 = vld [vmem:[#allocation8 + $0x24] ss:$8 sps:$4 sm:$0xff] (!%p2367_p12)  }
 0x219   : > { %v1367_v26 = vadd.f32 %v1366_v10, %v904_v20  ;;  %v1385_v8 = vadd.f32 %v1384_v11, %v1097_v21  ;;  %1952 = vmatprep.subr.bf16.mxu0 (!%p2367_p12), %v2700_v47  ;;  %v2706_v63 = vld [vmem:[#allocation8 + $0x124] ss:$8 sps:$4 sm:$0xff] (!%p2367_p12)   ;;  %v2710_v2 = vld [vmem:[#allocation8 + $0x34] ss:$8 sps:$4 sm:$0xff] (!%p2367_p12)   ;;  %v2714_v4 = vld [vmem:[#allocation8 + $0x30] ss:$8 sps:$4 sm:$0xff] (!%p2367_p12)  }
 0x21a   : > { %v1359_v27 = vrot.slane %v1358_v18, 4  ;;  %v1377_v9 = vrot.slane %v1376_v19, 4  ;;  %v2712_v3 = vld [vmem:[#allocation8 + $0x134] ss:$8 sps:$4 sm:$0xff] (!%p2367_p12)   ;;  %v2715_v5 = vld [vmem:[#allocation8 + $0x130] ss:$8 sps:$4 sm:$0xff] (!%p2367_p12)  }
 0x21b   : > { %v1368_v28 = vrot.slane %v1367_v26, 4  ;;  %v1386_v29 = vrot.slane %v1385_v8, 4  ;;  %1912 = vmatpush1.bf16.msra.mxu1 (!%p2367_p12), %v2702_v60  ;;  %v2720_v10 = vld [vmem:[#allocation8 + $0x40] ss:$8 sps:$4 sm:$0xff] (!%p2367_p12)   ;;  %v2722_v12 = vld [vmem:[#allocation8 + $0x54] ss:$8 sps:$4 sm:$0xff] (!%p2367_p12)  }
 0x21c   : > { %v1360_v34 = vadd.f32 %v1359_v27, %v1358_v18  ;;  %v1378_v16 = vadd.f32 %v1377_v9, %v1376_v19  ;;  %1953 = vmatpush1.bf16.msra.mxu0 (!%p2367_p12), %v2703_v61  ;;  %1913 = vmatprep.subr.bf16.mxu1 (!%p2367_p12), %v2704_v62  ;;  %v2721_v11 = vld [vmem:[#allocation8 + $0x140] ss:$8 sps:$4 sm:$0xff] (!%p2367_p12)   ;;  %v2724_v13 = vld [vmem:[#allocation8 + $0x154] ss:$8 sps:$4 sm:$0xff] (!%p2367_p12)   ;;  %v2726_v18 = vld [vmem:[#allocation8 + $0x50] ss:$8 sps:$4 sm:$0xff] (!%p2367_p12)  }
 0x21d   : > { %v1369_v35 = vadd.f32 %v1368_v28, %v1367_v26  ;;  %v1387_v14 = vadd.f32 %v1386_v29, %v1385_v8  ;;  %1954 = vmatprep.subr.bf16.mxu0 (!%p2367_p12), %v2706_v63  ;;  %v2727_v19 = vld [vmem:[#allocation8 + $0x150] ss:$8 sps:$4 sm:$0xff] (!%p2367_p12)   ;;  %v2728_v20 = vld [vmem:[#allocation8 + $0x64] ss:$8 sps:$4 sm:$0xff] (!%p2367_p12)   ;;  %v2732_v26 = vld [vmem:[#allocation8 + $0x60] ss:$8 sps:$4 sm:$0xff] (!%p2367_p12)  }
 0x21e   : > { %v1361_v17 = vrot.slane %v1360_v34, 2  ;;  %v1379_v15 = vrot.slane %v1378_v16, 2  ;;  %v2730_v21 = vld [vmem:[#allocation8 + $0x164] ss:$8 sps:$4 sm:$0xff] (!%p2367_p12)   ;;  %v2733_v8 = vld [vmem:[#allocation8 + $0x160] ss:$8 sps:$4 sm:$0xff] (!%p2367_p12)  }
 0x21f   : > { %v1370_v36 = vrot.slane %v1369_v35, 2  ;;  %v1388_v37 = vrot.slane %v1387_v14, 2  ;;  %v2734_v27 = vld [vmem:[#allocation8 + $0x74] ss:$8 sps:$4 sm:$0xff] (!%p2367_p12)   ;;  %v2738_v28 = vld [vmem:[#allocation8 + $0x70] ss:$8 sps:$4 sm:$0xff] (!%p2367_p12)  }
 0x220   : > { %v1362_v42 = vadd.f32 %v1361_v17, %v1360_v34  ;;  %v1380_v24 = vadd.f32 %v1379_v15, %v1378_v16  ;;  %v2736_v9 = vld [vmem:[#allocation8 + $0x174] ss:$8 sps:$4 sm:$0xff] (!%p2367_p12)   ;;  %v2739_v29 = vld [vmem:[#allocation8 + $0x170] ss:$8 sps:$4 sm:$0xff] (!%p2367_p12)   ;;  %v2740_v34 = vld [vmem:[#allocation8 + $0x84] ss:$8 sps:$4 sm:$0xff] (!%p2367_p12)   ;;  %v1485_v15 = vlaneseq (!%p2367_p12) }
 0x221   : > { %v1371_v43 = vadd.f32 %v1370_v36, %v1369_v35  ;;  %v1389_v22 = vadd.f32 %v1388_v37, %v1387_v14  ;;  %v2742_v16 = vld [vmem:[#allocation8 + $0x184] ss:$8 sps:$4 sm:$0xff] (!%p2367_p12)   ;;  %v2744_v35 = vld [vmem:[#allocation8 + $0x80] ss:$8 sps:$4 sm:$0xff] (!%p2367_p12)   ;;  %v2746_v17 = vld [vmem:[#allocation8 + $0x94] ss:$8 sps:$4 sm:$0xff] (!%p2367_p12)  }
 0x222   : > { %v1363_v25 = vrot.slane %v1362_v42, 1  ;;  %v1381_v23 = vrot.slane %v1380_v24, 1  ;;  %v2745_v14 = vld [vmem:[#allocation8 + $0x180] ss:$8 sps:$4 sm:$0xff] (!%p2367_p12)   ;;  %v2748_v36 = vld [vmem:[#allocation8 + $0x194] ss:$8 sps:$4 sm:$0xff] (!%p2367_p12)  }
 0x223   : > { %v1372_v44 = vrot.slane %v1371_v43, 1  ;;  %v1390_v45 = vrot.slane %v1389_v22, 1  ;;  %v2750_v37 = vld [vmem:[#allocation8 + $0x90] ss:$8 sps:$4 sm:$0xff] (!%p2367_p12)   ;;  %v2769_v57 = vld [vmem:[#allocation8 + $0x1c0] ss:$8 sps:$4 sm:$0xff] (!%p2367_p12)  }
 0x224   : > { %v1364_v32 = vadd.f32 %v1363_v25, %v1362_v42  ;;  %v1382_v30 = vadd.f32 %v1381_v23, %v1380_v24  ;;  %1474 = sbr.rel (%p2367_p12) target bundleno = 1046 (0x416), region = 72  ;;  %v2751_v42 = vld [vmem:[#allocation8 + $0x190] ss:$8 sps:$4 sm:$0xff] (!%p2367_p12)   ;;  %v2752_v24 = vld [vmem:[#allocation8 + $0xa4] ss:$8 sps:$4 sm:$0xff] (!%p2367_p12)  }
 0x225   : > { %v1373_v31 = vadd.f32 %v1372_v44, %v1371_v43  ;;  %v1391_v51 = vadd.f32 %v1390_v45, %v1389_v22  ;;  %v3386_v43 = vshrl.u32 (!%p2367_p12), %v1485_v15, 7  ;;  %v2754_v22 = vld [vmem:[#allocation8 + $0x1a4] ss:$8 sps:$4 sm:$0xff] (!%p2367_p12)   ;;  %v2756_v25 = vld [vmem:[#allocation8 + $0xa0] ss:$8 sps:$4 sm:$0xff] (!%p2367_p12)  }
 0x226   : > { %v1437_v52 = vsel %vm1436_vm6, %v1364_v32, %v1435_v0  ;;  %v1451_v40 = vsel %vm1436_vm6, %v1382_v30, %v1450_v1  ;;  %v2708_v0 = vld [vmem:[#allocation8 + $0x20] ss:$8 sps:$4 sm:$0xff] (!%p2367_p12)   ;;  %v2758_v44 = vld [vmem:[#allocation8 + $0xb4] ss:$8 sps:$4 sm:$0xff] (!%p2367_p12)   ;;  %v2774_v60 = vld [vmem:[#allocation8 + $0xd0] ss:$8 sps:$4 sm:$0xff] (!%p2367_p12)  }
 0x227   : > { %v1463_v53 = vadd.f32 %v1437_v52, %v1100_v48  ;;  %v1465_v38 = vadd.f32 %v1451_v40, %v1102_v49  ;;  %v1444_v41 = vsel %vm1436_vm6, %v1373_v31, %v1443_v6  ;;  %v1458_v39 = vsel %vm1436_vm6, %v1391_v51, %v1457_v7  ;;  %v2709_v1 = vld [vmem:[#allocation8 + $0x120] ss:$8 sps:$4 sm:$0xff] (!%p2367_p12)   ;;  %1914 = vmatpush1.bf16.msra.mxu1 (!%p2367_p12), %v2708_v0  ;;  %v2716_v6 = vld [vmem:[#allocation8 + $0x44] ss:$8 sps:$4 sm:$0xff] (!%p2367_p12)   ;;  %v2760_v32 = vld [vmem:[#allocation8 + $0x1b4] ss:$8 sps:$4 sm:$0xff] (!%p2367_p12)  }
 0x228   : > { %v1464_v54 = vadd.f32 %v1444_v41, %v1101_v33  ;;  %v1466_v55 = vadd.f32 %v1458_v39, %v1103_v50  ;;  %1955 = vmatpush1.bf16.msra.mxu0 (!%p2367_p12), %v2709_v1  ;;  %1915 = vmatprep.subr.bf16.mxu1 (!%p2367_p12), %v2710_v2  ;;  %v2718_v7 = vld [vmem:[#allocation8 + $0x144] ss:$8 sps:$4 sm:$0xff] (!%p2367_p12)   ;;  %v2757_v23 = vld [vmem:[#allocation8 + $0x1a0] ss:$8 sps:$4 sm:$0xff] (!%p2367_p12)   ;;  %v1491_v45 = vsub.s32 (!%p2367_p12), 1, %v3386_v43  ;;  %v1499_v48 = vsub.s32 (!%p2367_p12), 3, %v3386_v43 }
 0x229   : > { %1467 = vst [vmem:[#allocation2] sm:$0xff] %v1463_v53  ;;  %1469 = vst [vmem:[#allocation2 + $0x10] sm:$0xff] %v1465_v38  ;;  %1956 = vmatprep.subr.bf16.mxu0 (!%p2367_p12), %v2712_v3  ;;  %v2762_v49 = vld [vmem:[#allocation8 + $0xb0] ss:$8 sps:$4 sm:$0xff] (!%p2367_p12)   ;;  %v1483_v50 = vld [vmem:[%s3477_s2] sm:$0xf] (!%p2367_p12) }
 0x22a   : > { %1468 = vst [vmem:[#allocation2 + $0x8] sm:$0xff] %v1464_v54  ;;  %1470 = vst [vmem:[#allocation2 + $0x18] sm:$0xff] %v1466_v55  ;;  %v2763_v33 = vld [vmem:[#allocation8 + $0x1b0] ss:$8 sps:$4 sm:$0xff] (!%p2367_p12)   ;;  %v2764_v52 = vld [vmem:[#allocation8 + $0xc4] ss:$8 sps:$4 sm:$0xff] (!%p2367_p12)   ;;  %v1492_v40 = vrot.slane (!%p2367_p12), %v1483_v50, %v1491_v45  ;;  %v1500_v38 = vrot.slane (!%p2367_p12), %v1483_v50, %v1499_v48 }
 0x22b   : > { %1916 = vmatpush1.bf16.msra.mxu1 %v2714_v4  ;;  %v1487_v41 = vsub.s32 0, %v3386_v43  ;;  %v2766_v39 = vld [vmem:[#allocation8 + $0x1c4] ss:$8 sps:$4 sm:$0xff]   ;;  %v2768_v54 = vld [vmem:[#allocation8 + $0xc0] ss:$8 sps:$4 sm:$0xff]   ;;  %v1495_v0 = vsub.s32 2, %v3386_v43 }
 0x22c   : > { %1957 = vmatpush1.bf16.msra.mxu0 %v2715_v5  ;;  %1917 = vmatprep.subr.bf16.mxu1 %v2716_v6  ;;  %v2770_v58 = vld [vmem:[#allocation8 + $0xd4] ss:$8 sps:$4 sm:$0xff]   ;;  %v2775_v61 = vld [vmem:[#allocation8 + $0x1d0] ss:$8 sps:$4 sm:$0xff]   ;;  %v2776_v62 = vld [vmem:[#allocation8 + $0xe4] ss:$8 sps:$4 sm:$0xff]  }
 0x22d   : > { %1958 = vmatprep.subr.bf16.mxu0 %v2718_v7  ;;  %v2772_v47 = vld [vmem:[#allocation8 + $0x1d4] ss:$8 sps:$4 sm:$0xff]   ;;  %v2778_v2 = vld [vmem:[#allocation8 + $0x1e4] ss:$8 sps:$4 sm:$0xff]   ;;  %v2780_v3 = vld [vmem:[#allocation8 + $0xe0] ss:$8 sps:$4 sm:$0xff]  }
 0x22e   : > { %v2781_v4 = vld [vmem:[#allocation8 + $0x1e0] ss:$8 sps:$4 sm:$0xff]   ;;  %v2782_v5 = vld [vmem:[#allocation8 + $0xf4] ss:$8 sps:$4 sm:$0xff]  }
 0x22f   : > { %1918 = vmatpush1.bf16.msra.mxu1 %v2720_v10  ;;  %v2784_v6 = vld [vmem:[#allocation8 + $0x1f4] ss:$8 sps:$4 sm:$0xff]   ;;  %v1488_v10 = vrot.slane %v1483_v50, %v1487_v41  ;;  %v2798_v15 = vld [vmem:[#allocation9 + $0x68] sm:$0xff]  }
 0x230   : > { %1959 = vmatpush1.bf16.msra.mxu0 %v2721_v11  ;;  %1919 = vmatprep.subr.bf16.mxu1 %v2722_v12  ;;  %v1475_v63 = vld [vmem:[#allocation2] sm:$0xff]  ;;  %v1477_v1 = vld [vmem:[#allocation2 + $0x10] sm:$0xff]  ;;  %v1496_v12 = vrot.slane %v1483_v50, %v1495_v0 }
 0x231   : > { %1960 = vmatprep.subr.bf16.mxu0 %v2724_v13  ;;  %v1476_v30 = vld [vmem:[#allocation2 + $0x8] sm:$0xff]  ;;  %v1478_v51 = vld [vmem:[#allocation2 + $0x18] sm:$0xff]  ;;  %v1479_v7 = vmul.f32 0.015625, %v1475_v63  ;;  %v1481_v11 = vmul.f32 0.015625, %v1477_v1 }
 0x232   : > { %v1480_v31 = vmul.f32 0.015625, %v1476_v30  ;;  %v1482_v53 = vmul.f32 0.015625, %v1478_v51 }
 0x233   : > { %1920 = vmatpush1.bf16.msra.mxu1 %v2726_v18  ;;  %v1505_v13 = vadd.f32 %v1488_v10, %v1479_v7  ;;  %v1507_v18 = vadd.f32 %v1496_v12, %v1481_v11 }
 0x234   : > { %1961 = vmatpush1.bf16.msra.mxu0 %v2727_v19  ;;  %1921 = vmatprep.subr.bf16.mxu1 %v2728_v20  ;;  %v1506_v55 = vadd.f32 %v1492_v40, %v1480_v31  ;;  %v1508_v56 = vadd.f32 %v1500_v38, %v1482_v53  ;;  %v2786_v19 = vld [vmem:[#allocation8 + $0xf0] ss:$8 sps:$4 sm:$0xff]  }
 0x235   : > { %1962 = vmatprep.subr.bf16.mxu0 %v2730_v21  ;;  %v2787_v20 = vld [vmem:[#allocation8 + $0x1f0] ss:$8 sps:$4 sm:$0xff]   ;;  %v2788_v21 = vld [vmem:[#allocation9 + $0x40] sm:$0xff]  }
 0x236   : > { %v1510_v46 = vpack.c.bf16 %v1506_v55, %v1506_v55  ;;  %v1512_v59 = vpack.c.bf16 %v1508_v56, %v1508_v56 }
 0x237   : > { %1922 = vmatpush1.bf16.msra.mxu1 %v2732_v26  ;;  %v1509_v26 = vpack.c.bf16 %v1505_v13, %v1505_v13 }
 0x238   : > { %1963 = vmatpush1.bf16.msra.mxu0 %v2733_v8  ;;  %1923 = vmatprep.subr.bf16.mxu1 %v2734_v27  ;;  %v1511_v8 = vpack.c.bf16 %v1507_v18, %v1507_v18  ;;  %v2789_v27 = vld [vmem:[#allocation9] sm:$0xff]  }
 0x239   : > { %1964 = vmatprep.subr.bf16.mxu0 %v2736_v9  ;;  %1941 = vmatprep.mubr.bf16.mxu1 %v1510_v46  ;;  %v2790_v9 = vld [vmem:[#allocation9 + $0x48] sm:$0xff]  }
 0x23a   : > { %1982 = vmatprep.mubr.bf16.mxu0 %v1512_v59 }
 0x23b   : > { %1924 = vmatpush1.bf16.msra.mxu1 %v2738_v28  ;;  %v2791_v28 = vld [vmem:[#allocation9 + $0x8] sm:$0xff]  }
 0x23c   : > { %1965 = vmatpush1.bf16.msra.mxu0 %v2739_v29  ;;  %1925 = vmatprep.subr.bf16.mxu1 %v2740_v34  ;;  %v2792_v29 = vld [vmem:[#allocation9 + $0x50] sm:$0xff]  }
 0x23d   : > { %1966 = vmatprep.subr.bf16.mxu0 %v2742_v16  ;;  %v2793_v34 = vld [vmem:[#allocation9 + $0x10] sm:$0xff]   ;;  %v2794_v16 = vld [vmem:[#allocation9 + $0x58] sm:$0xff]  }
 0x23f   : > { %1926 = vmatpush1.bf16.msra.mxu1 %v2744_v35  ;;  %v2795_v35 = vld [vmem:[#allocation9 + $0x18] sm:$0xff]  }
 0x240   : > { %1967 = vmatpush1.bf16.msra.mxu0 %v2745_v14  ;;  %1927 = vmatprep.subr.bf16.mxu1 %v2746_v17  ;;  %v2796_v14 = vld [vmem:[#allocation9 + $0x60] sm:$0xff]  }
 0x241   : > { %1968 = vmatprep.subr.bf16.mxu0 %v2748_v36  ;;  %v2797_v17 = vld [vmem:[#allocation9 + $0x20] sm:$0xff]   ;;  %v2799_v36 = vld [vmem:[#allocation9 + $0x28] sm:$0xff]  }
 0x243   : > { %1928 = vmatpush1.bf16.msra.mxu1 %v2750_v37  ;;  %v2800_v37 = vld [vmem:[#allocation9 + $0x70] sm:$0xff]  }
 0x244   : > { %1969 = vmatpush1.bf16.msra.mxu0 %v2751_v42  ;;  %1929 = vmatprep.subr.bf16.mxu1 %v2752_v24  ;;  %v2801_v42 = vld [vmem:[#allocation9 + $0x30] sm:$0xff]   ;;  %v2802_v24 = vld [vmem:[#allocation9 + $0x78] sm:$0xff]  }
 0x245   : > { %1970 = vmatprep.subr.bf16.mxu0 %v2754_v22  ;;  %v2803_v22 = vld [vmem:[#allocation9 + $0x38] sm:$0xff]  }
 0x247   : > { %1930 = vmatpush1.bf16.msra.mxu1 %v2756_v25  ;;  %v1577_v25 = vld [vmem:[%s3523_s22] sm:$0x3] }
 0x248   : > { %1971 = vmatpush1.bf16.msra.mxu0 %v2757_v23  ;;  %1931 = vmatprep.subr.bf16.mxu1 %v2758_v44  ;;  %v1582_v23 = vrot.slane %v1577_v25, %v1487_v41  ;;  %v1586_v44 = vrot.slane %v1577_v25, %v1491_v45  ;;  %v2432_v45 = vld [vmem:[%s3524_s24] ss:$0 sm:$0xff] }
 0x249   : > { %1972 = vmatprep.subr.bf16.mxu0 %v2760_v32 }
 0x24b   : > { %1932 = vmatpush1.bf16.msra.mxu1 %v2762_v49 }
 0x24c   : > { %1973 = vmatpush1.bf16.msra.mxu0 %v2763_v33  ;;  %1933 = vmatprep.subr.bf16.mxu1 %v2764_v52 }
 0x24d   : > { %1974 = vmatprep.subr.bf16.mxu0 %v2766_v39 }
 0x24f   : > { %1934 = vmatpush1.bf16.msra.mxu1 %v2768_v54 }
 0x250   : > { %1975 = vmatpush1.bf16.msra.mxu0 %v2769_v57  ;;  %1935 = vmatprep.subr.bf16.mxu1 %v2770_v58 }
 0x251   : > { %1976 = vmatprep.subr.bf16.mxu0 %v2772_v47 }
 0x253   : > { %1936 = vmatpush1.bf16.msra.mxu1 %v2774_v60 }
 0x254   : > { %1977 = vmatpush1.bf16.msra.mxu0 %v2775_v61  ;;  %1937 = vmatprep.subr.bf16.mxu1 %v2776_v62 }
 0x255   : > { %1978 = vmatprep.subr.bf16.mxu0 %v2778_v2 }
 0x257   : > { %1938 = vmatpush1.bf16.msra.mxu1 %v2780_v3 }
 0x258   : > { %1979 = vmatpush1.bf16.msra.mxu0 %v2781_v4  ;;  %1939 = vmatprep.subr.bf16.mxu1 %v2782_v5 }
 0x259   : > { %1980 = vmatprep.subr.bf16.mxu0 %v2784_v6 }
 0x25b   : > { %1940 = vmatpush1.bf16.msra.mxu1 %v2786_v19 }
 0x25c   : > { %1981 = vmatpush1.bf16.msra.mxu0 %v2787_v20  ;;  %2454 = vmatprep.subr.bf16.mxu1 %v2788_v21 }
 0x25e   : > { %1942 = vmatmul.mubr.bf16.vlgmr.msra.gmra.mrb[0].mxu1 %v1509_v26 }
 0x25f   : > { %1983 = vmatmul.mubr.bf16.vlgmr.msra.gmra.mrb[0].mxu0 %v1511_v8  ;;  %2455 = vmatpush3.bf16.msra.mxu1 %v2789_v27 }
 0x260   : > { %2456 = vmatprep.subr.bf16.mxu1 %v2790_v9 }
 0x263   : > { %2457 = vmatpush3.bf16.msra.mxu1 %v2791_v28 }
 0x264   : > { %2458 = vmatprep.subr.bf16.mxu1 %v2792_v29 }
 0x267   : > { %2459 = vmatpush3.bf16.msra.mxu1 %v2793_v34 }
 0x268   : > { %2460 = vmatprep.subr.bf16.mxu1 %v2794_v16 }
 0x26b   : > { %2461 = vmatpush3.bf16.msra.mxu1 %v2795_v35 }
 0x26c   : > { %2462 = vmatprep.subr.bf16.mxu1 %v2796_v14 }
 0x26f   : > { %2463 = vmatpush3.bf16.msra.mxu1 %v2797_v17 }
 0x270   : > { %2464 = vmatprep.subr.bf16.mxu1 %v2798_v15 }
 0x273   : > { %2465 = vmatpush3.bf16.msra.mxu1 %v2799_v36 }
 0x274   : > { %2466 = vmatprep.subr.bf16.mxu1 %v2800_v37 }
 0x277   : > { %2467 = vmatpush3.bf16.msra.mxu1 %v2801_v42 }
 0x278   : > { %2468 = vmatprep.subr.bf16.mxu1 %v2802_v24 }
 0x27b   : > { %2469 = vmatpush3.bf16.msra.mxu1 %v2803_v22 }
 0x331   : > { %v1943_v48 = vpop.f32.mrb[0].mxu1 }
 0x332   : > { %v1984_v32 = vpop.f32.mrb[0].mxu0  ;;  %v1944_v49 = vadd.f32 %v1943_v48, %v1582_v23  ;;  %v1945_v30 = vpop.f32.mrb[1].mxu1 }
 0x333   : > { %v1986_v33 = vpop.f32.mrb[1].mxu0  ;;  %v1946_v31 = vadd.f32 %v1945_v30, %v1586_v44  ;;  %v1947_v50 = vpop.f32.mrb[2].mxu1 }
 0x334   : > { %v1988_v51 = vpop.f32.mrb[2].mxu0  ;;  %v1985_v52 = vadd.f32 %v1984_v32, %v1944_v49  ;;  %v1948_v40 = vpop.f32.mrb[3].mxu1 }
 0x335   : > { %v1989_v53 = vpop.f32.mrb[3].mxu0  ;;  %v1987_v38 = vadd.f32 %v1986_v33, %v1946_v31 }
 0x336   : > { %v1991_v39 = vmax.f32 %v1985_v52, 0.0 }
 0x337   : > { %v1992_v54 = vmax.f32 %v1987_v38, 0.0 }
 0x338   : > { %v1993_v41 = vpack.c.bf16 %v1991_v39, %v1991_v39 }
 0x339   : > { %v1994_v55 = vpack.c.bf16 %v1992_v54, %v1992_v54 }
 0x33b   : > { %2162 = vmatprep.mubr.bf16.mxu1 %v1994_v55 }
 0x33c   : > { %2163 = vmatmul.mubr.bf16.vlgmr.msra.gmra.mrb[4].mxu1 %v1993_v41 }
 0x40f   : > { %v2470_v43 = vpop.f32.mrb[4].mxu1 }
 0x410   : > { %v2471_v56 = vpop.f32.mrb[5].mxu1 }
 0x411   : > { %v2472_v57 = vadd.f32 %v2471_v56, %v2470_v43  ;;  %v2473_v58 = vpop.f32.mrb[6].mxu1 }
 0x412   : > { %v2474_v46 = vpop.f32.mrb[7].mxu1 }
 0x413   : > { %v2165_v59 = vadd.f32 %v2472_v57, %v2432_v45 }
 0x415   : > { %2170 = vst [vmem:[%s382_s21] sm:$0xff] %v2165_v59 }
 0x416 PF: > { %s3525_s1 = sld [smem:[#allocation21_spill]]  ;;  %s3526_s27 = sld [smem:[#allocation24_spill]] }
 0x417   : > { %s3527_s7 = sld [smem:[#allocation31_spill]]  ;;  %s2185_s15 = sshll.u32 %s382_s21, 4  ;;  %s2186_s15 = int_to_ptr.vmem [resolvable:$true] %s2185_s15 }
 0x418   : > { %s2172_s20 = scalar_lea.sflag [#allocation5], %s380_s18  ;;  %s2888_s23 = scalar_lea.vmem %s2186_s15, 128 }
 0x419   : > { %p2889_p5 = scmp.ne.s32.totalorder %s2186_s15, %s2888_s23  ;;  %s3036_s30 = smov [#allocation11]  }
 0x41a   : > { %s2892_s19 = sshll.u32 %s3036_s30, 4  ;;  %s2893_s19 = int_to_ptr.vmem [resolvable:$false] %s2892_s19 }
 0x41b   : > { %s2894_s17 = scalar_lea.vmem %s2893_s19, 256  ;;  %p2895_p1 = scmp.lt.s32.totalorder %s2186_s15, %s2893_s19 }
 0x41c   : > { %s2450_s26 = sshll.u32 %s3525_s1, 7  ;;  %p3528_p10 = scmp.ne.s32.totalorder %s3526_s27, 0 }
 0x41d   : > { %s3415_s13 = scalar_lea.hbm %s3527_s7, %s2450_s26  ;;  %p2896_p2 = scmp.lt.s32.totalorder %s2894_s17, %s2888_s23 }
 0x41e   : > { %p2890_p13 = pnand %p2889_p5, %p3528_p10 }
 0x41f   : > { %p2897_p8 = por %p2896_p2, %p2895_p1 }
 0x420   : > { %p2891_p0 = pneg %p2890_p13 }
 0x422   : > { %p2898_p4 = pnand %p2897_p8, %p2891_p0 }
 0x424   : > { %2901 = shalt.err (!%p2898_p4)
}
 0x425   : > { %s2902_s18 = scalar_lea.hbm %s3415_s13, 128  ;;  %s2906_s14 = scalar_lea.hbm %s3527_s7, 256 }
 0x426   : > { %p2903_p9 = scmp.ne.s32.totalorder %s3415_s13, %s2902_s18  ;;  %p2907_p3 = scmp.lt.u32.totalorder %s3415_s13, %s3527_s7 }
 0x427   : > { %p2908_p7 = scmp.lt.u32.totalorder %s2906_s14, %s2902_s18  ;;  %p2910_p5 = scmp.lt.u32.totalorder %s2902_s18, %s3415_s13 }
 0x428   : > { %p2904_p11 = pnand %p2903_p9, %p3528_p10 }
 0x429   : > { %p2909_p12 = por %p2908_p7, %p2907_p3 }
 0x42a   : > { %p2905_p6 = pneg %p2904_p11 }
 0x42b   : > { %p2911_p13 = por %p2910_p5, %p2909_p12 }
 0x42d   : > { %p2912_p0 = pnand %p2911_p13, %p2905_p6 }
 0x42f   : > { %2915 = shalt.err (!%p2912_p0)
}
 0x430   : > { %2501 = dma.vmem_to_hbm [thread:$0]  (%p3528_p10), %s2186_s15, 128, %s3415_s13, %s2172_s20  }
 0x431 PF: > { %s3529_s4 = sld [smem:[#allocation19_spill]]  ;;  %s3530_s24 = sld [smem:[#allocation27_spill]] }
 0x432   : > { %p2523_p1 = scmp.ge.s32.totalorder %s3018_s11, 2 }
 0x437   : > { %s2197_s1 = sand.u32 1, %s3529_s4   ;;  %p3531_p2 = scmp.ne.s32.totalorder %s3530_s24, 0 }
 0x438   : > { %s2198_s26 = scalar_lea.sflag [#allocation5], %s2197_s1 }
 0x439   : > { %p2514_p8 = pnand %p2523_p1, %p3531_p2 }
 0x43b   : > { %2973 = dma.done.wait (!%p2514_p8), %s2198_s26, 128  }
 0x43c   : > { %2975 = vsyncadd (!%p2514_p8), %s2198_s26, 4294967168  ;;  %s25_s11 = sadd.s32 1, %s3018_s11   ;;  %s3532_s8 = sld [smem:[#allocation20_spill]] }
 0x43d   : > { %p22_p4 = scmp.ge.s32.totalorder %s25_s11, 6   ;;  %s3533_s26 = sld [smem:[#allocation25_spill]] }
 0x43e   : > { %s3534_s16 = sld [smem:[#allocation26_spill]]  ;;  %s3535_s13 = sld [smem:[#allocation22_spill]] }
 0x43f   : > { %s3536_s15 = sld [smem:[#allocation23_spill]]  ;;  %s3537_s24 = smov %s2982_s25 }
 0x440   : > { %s3539_s27 = smov %s2994_s28  ;;  %s3540_s28 = smov %s2998_s29 }
 0x441   : > { %s3542_s30 = smov %s3010_s9  ;;  %24 = sbr.rel (!%p22_p4) target bundleno = 16 (0x10), region = 118 }
 0x442   : > { %s3538_s25 = smov %s3532_s8  ;;  %s3543_s8 = smov %s3014_s10 }
 0x444   : > { %s3541_s29 = smov %s3534_s16  ;;  %s3544_s9 = smov %s3535_s13 }
 0x445   : > { %s3545_s10 = smov %s3536_s15 }
 0x448   :  { %2203 = vsyncpa [#allocation4], 1 }
 0x449   :  { %2205 = vsyncpa [#allocation4 + $0x1], 1 }
 0x44a   :  { %2206 = vsyncpa [#allocation7], 1 }
 0x44b   :  { %2207 = vsyncpa [#allocation10], 1 }
 0x44c   :  { %2208 = vsyncpa [#allocation5], 1 }
 0x44d   :  { %2210 = vsyncpa [#allocation5 + $0x1], 1 }

</bundles_post_ra>
